<compile_context>
chip_gen: v7x
topology: tpu7x:2x2x1
jax: 0.10.0
libtpu: 0.0.40
codegen_flags: <defaults>
</compile_context>

<pallas_src>
import functools

import jax
import jax.numpy as jnp
from jax.experimental import pallas as pl
from jax.experimental.pallas import tpu as pltpu


def _round_up(x, m):
    return ((x + m - 1) // m) * m


# ----------------------------------------------------------------------------
# Kernel: fused Linear(1024, 2h) -> ReLU -> [Dropout] -> Linear(2h, h)
# ----------------------------------------------------------------------------
def _encoder_kernel(x_ref, w1_ref, b1_ref, w2_ref, b2_ref, o_ref, *,
                    act_dtype, drop_p, deterministic, seed):
    # x_ref : (tm, 1024) f32         w1_ref: (1024, 2h) bf16 (pre-transposed)
    # b1_ref: (1, 2h)    f32         w2_ref: (2h, Hp)   bf16 (pre-transposed)
    # b2_ref: (1, Hp)    f32         o_ref : (tm, Hp)   out_dtype
    x = x_ref[...].astype(jnp.bfloat16)       # per-tile cast; exact for 0/1 bits
    h1 = jnp.dot(x, w1_ref[...], preferred_element_type=jnp.float32)

    # Bias + ReLU (+ dropout) in act_dtype: bf16 on v6e/v7x, f32 on v5e.
    h1 = h1.astype(act_dtype) + b1_ref[...].astype(act_dtype)
    h1 = jnp.maximum(h1, 0.0)

    if (not deterministic) and drop_p > 0.0:
        # Training-mode dropout via the hardware PRNG (deterministic per tile).
        # TODO(synk): cannot reproduce PyTorch's nn.Dropout RNG stream; default
        # path (deterministic=True) matches module.eval() exactly.
        pltpu.prng_seed(seed + pl.program_id(0))
        bits = pltpu.bitcast(pltpu.prng_random_bits(h1.shape), jnp.uint32)
        thresh = jnp.uint32(min(int(drop_p * (2 ** 32)), 2 ** 32 - 1))
        keep = bits >= thresh
        h1 = jnp.where(keep, h1 * (1.0 / (1.0 - drop_p)), 0.0)

    y = jnp.dot(h1.astype(jnp.bfloat16), w2_ref[...],
                preferred_element_type=jnp.float32)
    y = y + b2_ref[...]                        # final bias add in f32
    o_ref[...] = y.astype(o_ref.dtype)


# ----------------------------------------------------------------------------
# Tile / VMEM heuristics
# ----------------------------------------------------------------------------
def _default_activation_dtype():
    # v6e / v7x have a bf16 VPU -> keep the elementwise chain in bf16 (halves
    # the h1 intermediate); v5e does not -> stay in f32.
    try:
        kind = jax.devices()[0].device_kind.lower()
    except Exception:
        return jnp.bfloat16
    if "v5 lite" in kind or "v5e" in kind or "v5lite" in kind:
        return jnp.float32
    return jnp.bfloat16


def _choose_tile_m(M, tile_m):
    tm = min(int(tile_m), M)
    # Ensure >=2 grid steps when possible so both v7x TensorCores get work.
    if tm >= M and M > 8:
        tm = -(-M // 2)
    if tm >= 128:
        tm -= tm % 128            # MXU / lane friendly
    elif tm >= 8:
        tm -= tm % 8              # sublane aligned
    else:
        tm = M                    # tiny batch: single full block
    return max(tm, 1)


def _vmem_bytes(tm, K, H2, Hp, x_bytes, out_bytes, act_bytes):
    b = 2 * tm * K * x_bytes               # x tile, double buffered
    b += 2 * tm * Hp * out_bytes           # out tile, double buffered
    b += 2 * (K * H2 + H2 * Hp) * 2        # bf16 weights (worst case 2 buffers)
    b += 2 * (H2 + Hp) * 4                 # biases
    b += tm * H2 * (4 + act_bytes)         # matmul-1 f32 acc + h1 intermediate
    b += tm * Hp * 4                       # matmul-2 f32 acc
    return b


# ----------------------------------------------------------------------------
# Wrapper
# ----------------------------------------------------------------------------
def fragment_ecfp_encoder(frp_batch, frp_masks, params, *, drop_p=0.0,
                          deterministic=True, seed=0, tile_m=512,
                          out_dtype=jnp.float32, activation_dtype=None):
    """frp_batch: (..., 1024) -> (encoder(frp_batch): (..., h), frp_masks)."""
    w1, b1, w2, b2 = params["w1"], params["b1"], params["w2"], params["b2"]
    K, H2 = w1.shape
    H = w2.shape[1]
    assert frp_batch.shape[-1] == K

    if activation_dtype is None:
        activation_dtype = _default_activation_dtype()

    lead = frp_batch.shape[:-1]
    M = 1
    for d in lead:
        M *= int(d)

    # No wrapper-side cast/pad of the activations (that pass would add 2-3x the
    # kernel's own HBM traffic); the kernel casts each tile to bf16 itself.
    x = frp_batch.reshape(M, K)

    # Lane-dense output: pad output-feature dim to a multiple of 128 so stores
    # take the unmasked vst path (weight-sized one-time pad; production h
    # should be stored pre-padded / chosen as a multiple of 128).
    Hp = _round_up(H, 128)
    b1 = jnp.reshape(b1, (1, H2)).astype(jnp.float32)
    b2 = jnp.reshape(b2, (1, H)).astype(jnp.float32)
    if Hp != H:
        w2 = jnp.pad(w2, ((0, 0), (0, Hp - H)))
        b2 = jnp.pad(b2, ((0, 0), (0, Hp - H)))

    x_bytes = jnp.dtype(x.dtype).itemsize
    out_bytes = jnp.dtype(out_dtype).itemsize
    act_bytes = jnp.dtype(activation_dtype).itemsize

    tm = _choose_tile_m(M, tile_m)
    # Shrink the row tile until the working set fits a conservative budget
    # (v7x has 64 MiB physical VMEM; leave headroom for compiler scratch).
    budget = 48 * 2 ** 20
    while tm > 128 and _vmem_bytes(tm, K, H2, Hp, x_bytes, out_bytes,
                                   act_bytes) > budget:
        tm = max(128, (tm // 2) - ((tm // 2) % 128))

    grid = (pl.cdiv(M, tm),)
    needed = _vmem_bytes(tm, K, H2, Hp, x_bytes, out_bytes, act_bytes)
    vmem_limit = int(min(max(needed * 3 // 2, 16 * 2 ** 20), 64 * 2 ** 20))

    flops = 2 * M * (K * H2 + H2 * Hp)
    bytes_accessed = (M * K * x_bytes + M * Hp * out_bytes
                      + (K * H2 + H2 * Hp) * 2 + (H2 + Hp) * 4)

    kernel = functools.partial(
        _encoder_kernel, act_dtype=activation_dtype, drop_p=float(drop_p),
        deterministic=bool(deterministic), seed=int(seed))

    def _call(single_buffer_weights):
        def wspec(shape):
            if single_buffer_weights:
                # Constant-index blocks never change -> one VMEM buffer suffices.
                return pl.BlockSpec(shape, lambda i: (0, 0),
                                    pipeline_mode=pl.Buffered(1))
            return pl.BlockSpec(shape, lambda i: (0, 0))

        return pl.pallas_call(
            kernel,
            out_shape=jax.ShapeDtypeStruct((M, Hp), out_dtype),
            grid=grid,
            in_specs=[
                pl.BlockSpec((tm, K), lambda i: (i, 0)),   # x tile (pipelined over M)
                wspec((K, H2)),                            # w1 resident
                wspec((1, H2)),                            # b1
                wspec((H2, Hp)),                           # w2 resident
                wspec((1, Hp)),                            # b2
            ],
            out_specs=pl.BlockSpec((tm, Hp), lambda i: (i, 0)),
            compiler_params=pltpu.CompilerParams(
                dimension_semantics=("parallel",),
                vmem_limit_bytes=vmem_limit),
            cost_estimate=pl.CostEstimate(flops=flops, transcendentals=0,
                                          bytes_accessed=bytes_accessed),
        )(x, w1, b1, w2, b2)

    try:
        out = _call(True)        # single-buffered resident weights
    except Exception:
        out = _call(False)       # fallback: jax without pipeline_mode / Buffered(1)

    if Hp != H:
        out = out[:, :H]
    out = out.reshape(*lead, H)
    # Mask pass-through (identity in the PyTorch module).
    return out, frp_masks


# ----------------------------------------------------------------------------
# Parameter init (PyTorch nn.Linear-style), stored pre-transposed + bf16.
# ----------------------------------------------------------------------------
def init_params(key, h):
    k1, k2, k3, k4 = jax.random.split(key, 4)
    fan1, fan2 = 1024, h * 2
    w1 = jax.random.uniform(k1, (h * 2, 1024), jnp.float32, -1.0, 1.0) / fan1 ** 0.5
    b1 = jax.random.uniform(k2, (h * 2,), jnp.float32, -1.0, 1.0) / fan1 ** 0.5
    w2 = jax.random.uniform(k3, (h, h * 2), jnp.float32, -1.0, 1.0) / fan2 ** 0.5
    b2 = jax.random.uniform(k4, (h,), jnp.float32, -1.0, 1.0) / fan2 ** 0.5
    return {
        "w1": w1.T.astype(jnp.bfloat16),   # (1024, 2h) pre-transposed, bf16 MXU operand
        "b1": b1.reshape(1, -1),           # f32
        "w2": w2.T.astype(jnp.bfloat16),   # (2h, h)  pre-transposed, bf16 MXU operand
        "b2": b2.reshape(1, -1),           # f32
    }


def reference(frp_batch, params):
    x = frp_batch.astype(jnp.float32)
    w1 = params["w1"].astype(jnp.float32)
    w2 = params["w2"].astype(jnp.float32)
    h1 = jnp.maximum(x @ w1 + params["b1"].reshape(1, -1), 0.0)
    # Inference-mode dropout is identity (matches nn.Dropout in eval()).
    return h1 @ w2 + params["b2"].reshape(1, -1)


# ----------------------------------------------------------------------------
if __name__ == "__main__":
    H = 128          # module hyperparameter h (multiple of 128 -> lane-dense out)
    DROP = 0.1       # dropout prob d (identity at inference)
    B, F = 2, 16     # 2 molecules x 16 fragment ECFP fingerprints

    key = jax.random.PRNGKey(0)
    kp, kx, km = jax.random.split(key, 3)
    params = init_params(kp, H)
    frp_batch = jax.random.bernoulli(kx, 0.1, (B, F, 1024)).astype(jnp.float32)
    frp_masks = jax.random.bernoulli(km, 0.8, (B, F)).astype(jnp.float32)

    enc, masks_out = fragment_ecfp_encoder(frp_batch, frp_masks, params,
                                           drop_p=DROP, deterministic=True)
    jax.block_until_ready((enc, masks_out))

    assert enc.shape == (B, F, H) and enc.dtype == jnp.float32
    assert masks_out.shape == (B, F)

    ref = reference(frp_batch, params)
    max_err = float(jnp.max(jnp.abs(enc - ref)))
    assert max_err < 5e-2, f"max abs err {max_err}"

    # Ragged M (no wrapper pad): the last row tile is partially out of range
    # and relies on Pallas' masked block-edge handling.
    frp_ragged = frp_batch[:, :13, :]                     # M = 26 rows
    enc_r, _ = fragment_ecfp_encoder(frp_ragged, frp_masks[:, :13], params,
                                     drop_p=DROP, deterministic=True)
    jax.block_until_ready(enc_r)
    max_err_r = float(jnp.max(jnp.abs(enc_r - reference(frp_ragged, params))))
    assert max_err_r < 5e-2, f"ragged max abs err {max_err_r}"

    print("KERNEL_OK")
</pallas_src>

<mosaic_0001>
module attributes {stable_mosaic.version = 11 : i64} {
  func.func @_encoder_kernel(%arg0: i32, %arg1: memref<16x1024xf32, #tpu.memory_space<vmem>>, %arg2: memref<1024x256xbf16, #tpu.memory_space<vmem>>, %arg3: memref<1x256xf32, #tpu.memory_space<vmem>>, %arg4: memref<256x128xbf16, #tpu.memory_space<vmem>>, %arg5: memref<1x128xf32, #tpu.memory_space<vmem>>, %arg6: memref<16x128xf32, #tpu.memory_space<vmem>>) attributes {dimension_semantics = [#tpu.dimension_semantics<parallel>], iteration_bounds = array<i64: 2>, scalar_prefetch = 0 : i64, scratch_operands = 0 : i64, tpu.core_type = #tpu.core_type<tc>, window_params = [{transform_indices = @transform_0, window_bounds = array<i64: 16, 1024>}, {pipeline_mode = #tpu.pipeline_mode<synchronous>, transform_indices = @transform_1, window_bounds = array<i64: 1024, 256>}, {pipeline_mode = #tpu.pipeline_mode<synchronous>, transform_indices = @transform_2, window_bounds = array<i64: 1, 256>}, {pipeline_mode = #tpu.pipeline_mode<synchronous>, transform_indices = @transform_3, window_bounds = array<i64: 256, 128>}, {pipeline_mode = #tpu.pipeline_mode<synchronous>, transform_indices = @transform_4, window_bounds = array<i64: 1, 128>}, {transform_indices = @transform_5, window_bounds = array<i64: 16, 128>}]} {
    %c0 = arith.constant 0 : index
    %c0_0 = arith.constant 0 : index
    %0 = vector.load %arg1[%c0, %c0_0] : memref<16x1024xf32, #tpu.memory_space<vmem>>, vector<16x1024xf32>
    %1 = arith.truncf %0 : vector<16x1024xf32> to vector<16x1024xbf16>
    %c0_1 = arith.constant 0 : index
    %c0_2 = arith.constant 0 : index
    %2 = vector.load %arg2[%c0_1, %c0_2] : memref<1024x256xbf16, #tpu.memory_space<vmem>>, vector<1024x256xbf16>
    %cst = arith.constant dense<0.000000e+00> : vector<16x256xf32>
    %3 = tpu.matmul %1, %2, %cst {dimension_numbers = #tpu.dot_dimension_numbers<[1], [0], [0], [1], [0, 0, 1, 1], [], []>} : vector<16x1024xbf16>, vector<1024x256xbf16>, vector<16x256xf32> -> vector<16x256xf32>
    %4 = arith.truncf %3 : vector<16x256xf32> to vector<16x256xbf16>
    %c0_3 = arith.constant 0 : index
    %c0_4 = arith.constant 0 : index
    %5 = vector.load %arg3[%c0_3, %c0_4] : memref<1x256xf32, #tpu.memory_space<vmem>>, vector<1x256xf32>
    %6 = arith.truncf %5 : vector<1x256xf32> to vector<1x256xbf16>
    %7 = vector.broadcast %6 : vector<1x256xbf16> to vector<16x256xbf16>
    %8 = arith.addf %4, %7 : vector<16x256xbf16>
    %cst_5 = arith.constant 0.000000e+00 : bf16
    %9 = vector.broadcast %cst_5 : bf16 to vector<16x256xbf16>
    %10 = arith.maximumf %8, %9 : vector<16x256xbf16>
    %c0_6 = arith.constant 0 : index
    %c0_7 = arith.constant 0 : index
    %11 = vector.load %arg4[%c0_6, %c0_7] : memref<256x128xbf16, #tpu.memory_space<vmem>>, vector<256x128xbf16>
    %cst_8 = arith.constant dense<0.000000e+00> : vector<16x128xf32>
    %12 = tpu.matmul %10, %11, %cst_8 {dimension_numbers = #tpu.dot_dimension_numbers<[1], [0], [0], [1], [0, 0, 1, 1], [], []>} : vector<16x256xbf16>, vector<256x128xbf16>, vector<16x128xf32> -> vector<16x128xf32>
    %c0_9 = arith.constant 0 : index
    %c0_10 = arith.constant 0 : index
    %13 = vector.load %arg5[%c0_9, %c0_10] : memref<1x128xf32, #tpu.memory_space<vmem>>, vector<1x128xf32>
    %14 = vector.broadcast %13 : vector<1x128xf32> to vector<16x128xf32>
    %15 = arith.addf %12, %14 : vector<16x128xf32>
    %c0_11 = arith.constant 0 : index
    %c0_12 = arith.constant 0 : index
    %16 = vector.load %arg6[%c0_11, %c0_12] : memref<16x128xf32, #tpu.memory_space<vmem>>, vector<16x128xf32>
    tpu.vector_store %arg6[%c0_11, %c0_12], %15 {strides = array<i32>} : memref<16x128xf32, #tpu.memory_space<vmem>>, vector<16x128xf32>,
    return
  }
  func.func @transform_0(%arg0: i32) -> (i32, i32) {
    %c0_i32 = arith.constant 0 : i32
    %c0_i32_0 = arith.constant 0 : i32
    return %arg0, %c0_i32 : i32, i32
  }
  func.func @transform_1(%arg0: i32) -> (i32, i32) {
    %c0_i32 = arith.constant 0 : i32
    %c0_i32_0 = arith.constant 0 : i32
    %c0_i32_1 = arith.constant 0 : i32
    return %c0_i32, %c0_i32_0 : i32, i32
  }
  func.func @transform_2(%arg0: i32) -> (i32, i32) {
    %c0_i32 = arith.constant 0 : i32
    %c0_i32_0 = arith.constant 0 : i32
    %c0_i32_1 = arith.constant 0 : i32
    return %c0_i32, %c0_i32_0 : i32, i32
  }
  func.func @transform_3(%arg0: i32) -> (i32, i32) {
    %c0_i32 = arith.constant 0 : i32
    %c0_i32_0 = arith.constant 0 : i32
    %c0_i32_1 = arith.constant 0 : i32
    return %c0_i32, %c0_i32_0 : i32, i32
  }
  func.func @transform_4(%arg0: i32) -> (i32, i32) {
    %c0_i32 = arith.constant 0 : i32
    %c0_i32_0 = arith.constant 0 : i32
    %c0_i32_1 = arith.constant 0 : i32
    return %c0_i32, %c0_i32_0 : i32, i32
  }
  func.func @transform_5(%arg0: i32) -> (i32, i32) {
    %c0_i32 = arith.constant 0 : i32
    %c0_i32_0 = arith.constant 0 : i32
    return %arg0, %c0_i32 : i32, i32
  }
}

module attributes {stable_mosaic.version = 11 : i64} {
  func.func @_encoder_kernel(%arg0: i32, %arg1: memref<16x1024xf32, #tpu.memory_space<vmem>>, %arg2: memref<1024x256xbf16, #tpu.memory_space<vmem>>, %arg3: memref<1x256xf32, #tpu.memory_space<vmem>>, %arg4: memref<256x128xbf16, #tpu.memory_space<vmem>>, %arg5: memref<1x128xf32, #tpu.memory_space<vmem>>, %arg6: memref<16x128xf32, #tpu.memory_space<vmem>>) attributes {dimension_semantics = [#tpu.dimension_semantics<parallel>], iteration_bounds = array<i64: 2>, scalar_prefetch = 0 : i64, scratch_operands = 0 : i64, tpu.core_type = #tpu.core_type<tc>, window_params = [{transform_indices = @transform_0, window_bounds = array<i64: 16, 1024>}, {pipeline_mode = #tpu.pipeline_mode<synchronous>, transform_indices = @transform_1, window_bounds = array<i64: 1024, 256>}, {pipeline_mode = #tpu.pipeline_mode<synchronous>, transform_indices = @transform_2, window_bounds = array<i64: 1, 256>}, {pipeline_mode = #tpu.pipeline_mode<synchronous>, transform_indices = @transform_3, window_bounds = array<i64: 256, 128>}, {pipeline_mode = #tpu.pipeline_mode<synchronous>, transform_indices = @transform_4, window_bounds = array<i64: 1, 128>}, {transform_indices = @transform_5, window_bounds = array<i64: 16, 128>}]} {
    %c0 = arith.constant 0 : index
    %c0_0 = arith.constant 0 : index
    %0 = vector.load %arg1[%c0, %c0_0] : memref<16x1024xf32, #tpu.memory_space<vmem>>, vector<16x1024xf32>
    %1 = arith.truncf %0 : vector<16x1024xf32> to vector<16x1024xbf16>
    %c0_1 = arith.constant 0 : index
    %c0_2 = arith.constant 0 : index
    %2 = vector.load %arg2[%c0_1, %c0_2] : memref<1024x256xbf16, #tpu.memory_space<vmem>>, vector<1024x256xbf16>
    %cst = arith.constant dense<0.000000e+00> : vector<16x256xf32>
    %3 = tpu.matmul %1, %2, %cst {dimension_numbers = #tpu.dot_dimension_numbers<[1], [0], [0], [1], [0, 0, 1, 1], [], []>} : vector<16x1024xbf16>, vector<1024x256xbf16>, vector<16x256xf32> -> vector<16x256xf32>
    %4 = arith.truncf %3 : vector<16x256xf32> to vector<16x256xbf16>
    %c0_3 = arith.constant 0 : index
    %c0_4 = arith.constant 0 : index
    %5 = vector.load %arg3[%c0_3, %c0_4] : memref<1x256xf32, #tpu.memory_space<vmem>>, vector<1x256xf32>
    %6 = arith.truncf %5 : vector<1x256xf32> to vector<1x256xbf16>
    %7 = vector.broadcast %6 : vector<1x256xbf16> to vector<16x256xbf16>
    %8 = arith.addf %4, %7 : vector<16x256xbf16>
    %cst_5 = arith.constant 0.000000e+00 : bf16
    %9 = vector.broadcast %cst_5 : bf16 to vector<16x256xbf16>
    %10 = arith.maximumf %8, %9 : vector<16x256xbf16>
    %c0_6 = arith.constant 0 : index
    %c0_7 = arith.constant 0 : index
    %11 = vector.load %arg4[%c0_6, %c0_7] : memref<256x128xbf16, #tpu.memory_space<vmem>>, vector<256x128xbf16>
    %cst_8 = arith.constant dense<0.000000e+00> : vector<16x128xf32>
    %12 = tpu.matmul %10, %11, %cst_8 {dimension_numbers = #tpu.dot_dimension_numbers<[1], [0], [0], [1], [0, 0, 1, 1], [], []>} : vector<16x256xbf16>, vector<256x128xbf16>, vector<16x128xf32> -> vector<16x128xf32>
    %c0_9 = arith.constant 0 : index
    %c0_10 = arith.constant 0 : index
    %13 = vector.load %arg5[%c0_9, %c0_10] : memref<1x128xf32, #tpu.memory_space<vmem>>, vector<1x128xf32>
    %14 = vector.broadcast %13 : vector<1x128xf32> to vector<16x128xf32>
    %15 = arith.addf %12, %14 : vector<16x128xf32>
    %c0_11 = arith.constant 0 : index
    %c0_12 = arith.constant 0 : index
    %16 = vector.load %arg6[%c0_11, %c0_12] : memref<16x128xf32, #tpu.memory_space<vmem>>, vector<16x128xf32>
    tpu.vector_store %arg6[%c0_11, %c0_12], %15 {strides = array<i32>} : memref<16x128xf32, #tpu.memory_space<vmem>>, vector<16x128xf32>,
    return
  }
  func.func @transform_0(%arg0: i32) -> (i32, i32) {
    %c0_i32 = arith.constant 0 : i32
    %c0_i32_0 = arith.constant 0 : i32
    return %arg0, %c0_i32 : i32, i32
  }
  func.func @transform_1(%arg0: i32) -> (i32, i32) {
    %c0_i32 = arith.constant 0 : i32
    %c0_i32_0 = arith.constant 0 : i32
    %c0_i32_1 = arith.constant 0 : i32
    return %c0_i32, %c0_i32_0 : i32, i32
  }
  func.func @transform_2(%arg0: i32) -> (i32, i32) {
    %c0_i32 = arith.constant 0 : i32
    %c0_i32_0 = arith.constant 0 : i32
    %c0_i32_1 = arith.constant 0 : i32
    return %c0_i32, %c0_i32_0 : i32, i32
  }
  func.func @transform_3(%arg0: i32) -> (i32, i32) {
    %c0_i32 = arith.constant 0 : i32
    %c0_i32_0 = arith.constant 0 : i32
    %c0_i32_1 = arith.constant 0 : i32
    return %c0_i32, %c0_i32_0 : i32, i32
  }
  func.func @transform_4(%arg0: i32) -> (i32, i32) {
    %c0_i32 = arith.constant 0 : i32
    %c0_i32_0 = arith.constant 0 : i32
    %c0_i32_1 = arith.constant 0 : i32
    return %c0_i32, %c0_i32_0 : i32, i32
  }
  func.func @transform_5(%arg0: i32) -> (i32, i32) {
    %c0_i32 = arith.constant 0 : i32
    %c0_i32_0 = arith.constant 0 : i32
    return %arg0, %c0_i32 : i32, i32
  }
}

</mosaic_0001>

<bundles_post_ra>
// kernel: tpu_custom_call.1
= control target key start
LH: loop header
LB: loop body
LE: loop exit
PB: predicated region body
PF: predicated region fallthrough
CT: control target
= control target key end

     0   :  { %10 = vsyncpa [#allocation3], 0  ;;  %s2504_s0 = inlined_call_operand.hbm [shape: f32[32,1024], index: 0, kind: input, shape index: {}]   ;;  %s2505_s1 = inlined_call_operand.hbm [shape: bf16[1024,256], index: 1, kind: input, shape index: {}]   ;;  %s2506_s2 = inlined_call_operand.vmem [shape: f32[1,256], index: 2, kind: input, shape index: {}]   ;;  %s2507_s3 = inlined_call_operand.hbm [shape: bf16[256,128], index: 3, kind: input, shape index: {}]   ;;  %s2508_s4 = inlined_call_operand.vmem [shape: f32[1,128], index: 4, kind: input, shape index: {}]   ;;  %s2509_s5 = inlined_call_operand.hbm [shape: f32[32,128], index: 5, kind: output, shape index: {}]  }
   0x1   :  { %12 = vsyncpa [#allocation3 + $0x1], 0 }
   0x2   :  { %13 = vsyncpa [#allocation6], 0 }
   0x3   :  { %14 = vsyncpa [#allocation4], 0 }
   0x4   :  { %16 = vsyncpa [#allocation4 + $0x1], 0  ;;  %s2242_s18 = smov 0   ;;  %s2244_s19 = smov 0  }
   0x5   :  { %s2246_s20 = smov 0   ;;  %s2248_s21 = smov 0  }
   0x6 LB: > { %s2263_s22 = sadd.s32 4294967295, %s2198_s21   ;;  %s1558_s23 = sadd.s32 4294967294, %s2198_s21   ;;  %s2198_s21 = sphi %s2248_s21, %s2529_s21   ;;  %s2194_s20 = sphi %s2246_s20, %s2528_s20   ;;  %s2190_s19 = sphi %s2244_s19, %s2527_s19   ;;  %s2186_s18 = sphi %s2242_s18, %s2526_s18  }
   0x7   : > { %p42_p0 = scmp.ne.s32.totalorder %s2190_s19, %s2186_s18  ;;  %p2510_p1 = scmp.eq.s32.totalorder %s2263_s22, 0 }
   0x8   : > { %p156_p3 = scmp.eq.s32.totalorder %s1558_s23, 1  ;;  %p1559_p5 = scmp.ge.s32.totalorder %s2198_s21, 1 }
   0x9   : > { %p2272_p4 = por %p2510_p1, %p42_p0  ;;  %p163_p7 = scmp.lt.s32.totalorder %s2198_s21, 3 }
   0xa   : > { %p2277_p6 = por %p156_p3, %p42_p0  ;;  %s2200_s27 = smov [#allocation5]  }
   0xb   : > { %s2513_s24 = scalar_select %p2272_p4, 1, 0 }
   0xc   : > { %s2514_s25 = scalar_select %p2277_p6, 1, 0 }
   0xd   : > { %p2282_p8 = pnand %p1559_p5, %p163_p7  ;;  %s175_s28 = sshll.u32 %s2200_s27, 4  ;;  %s2286_s28 = int_to_ptr.vmem [resolvable:$true] %s175_s28 }
   0xe   : > { %s2201_s30 = smov [#allocation7]   ;;  %s2042_s9 = scalar_lea.hbm %s2505_s1, 16384 }
   0xf   : > { %p1771_p9 = pneg %p2282_p8  ;;  %s191_s6 = sshll.u32 %s2201_s30, 4  ;;  %s2297_s6 = int_to_ptr.vmem [resolvable:$true] %s191_s6 }
  0x10   : > { %p2043_p12 = scmp.ne.s32.totalorder %s2505_s1, %s2042_s9  ;;  %p2049_p5 = scmp.lt.u32.totalorder %s2042_s9, %s2505_s1 }
  0x11   : > { %p2293_p11 = pnand %p1771_p9, %p2510_p1 }
  0x13   : > { %p2044_p13 = pneg %p2293_p11 }
  0x15   : > { %p2045_p0 = pnand %p2044_p13, %p2043_p12 }
  0x17   : > { %p2046_p3 = pneg %p2045_p0 }
  0x19   : > { %p2051_p7 = pnand %p2049_p5, %p2046_p3 }
  0x1b   : > { %2054 = shalt.err (!%p2051_p7)
}
  0x1c   : > { %s2055_s14 = scalar_lea.vmem %s2286_s28, 16384  ;;  %p2063_p2 = scmp.lt.s32.totalorder %s2286_s28, %s2286_s28 }
  0x1d   : > { %p2056_p9 = scmp.ne.s32.totalorder %s2286_s28, %s2055_s14  ;;  %p2064_p12 = scmp.lt.s32.totalorder %s2055_s14, %s2055_s14 }
  0x1f   : > { %p2058_p10 = pnand %p2056_p9, %p2044_p13  ;;  %p2065_p0 = por %p2064_p12, %p2063_p2 }
  0x21   : > { %p2059_p1 = pneg %p2058_p10 }
  0x23   : > { %p2066_p6 = pnand %p2065_p0, %p2059_p1 }
  0x25   : > { %2069 = shalt.err (!%p2066_p6)
}
  0x26   : > { %s2202_s15 = smov 128   ;;  %s2203_s16 = smov 8  }
  0x27   : > { %1774 = dma.hbm_to_vmem [thread:$0]  (!%p2293_p11), %s2505_s1, 16384, %s2286_s28, [#allocation6], %s2202_s15, %s2202_s15, %s2203_s16  }
  0x28   : > { %s2070_s7 = scalar_lea.hbm %s2507_s3, 2048 }
  0x29   : > { %p2071_p2 = scmp.ne.s32.totalorder %s2507_s3, %s2070_s7  ;;  %p2077_p10 = scmp.lt.u32.totalorder %s2070_s7, %s2507_s3 }
  0x2b   : > { %p2073_p1 = pnand %p2071_p2, %p2044_p13 }
  0x2d   : > { %p2074_p6 = pneg %p2073_p1 }
  0x2f   : > { %p2079_p3 = pnand %p2077_p10, %p2074_p6 }
  0x31   : > { %2082 = shalt.err (!%p2079_p3)
}
  0x32   : > { %s2083_s28 = scalar_lea.vmem %s2297_s6, 2048  ;;  %p2091_p12 = scmp.lt.s32.totalorder %s2297_s6, %s2297_s6 }
  0x33   : > { %p2084_p5 = scmp.ne.s32.totalorder %s2297_s6, %s2083_s28  ;;  %p2092_p0 = scmp.lt.s32.totalorder %s2083_s28, %s2083_s28 }
  0x35   : > { %p2086_p7 = pnand %p2084_p5, %p2044_p13  ;;  %p2093_p2 = por %p2092_p0, %p2091_p12 }
  0x37   : > { %p2087_p9 = pneg %p2086_p7 }
  0x39   : > { %p2094_p1 = pnand %p2093_p2, %p2087_p9 }
  0x3b   : > { %2097 = shalt.err (!%p2094_p1)
}
  0x3c   : > { %s2204_s12 = smov 64   ;;  %s2205_s13 = smov 4  }
  0x3d   : > { %1777 = dma.hbm_to_vmem [thread:$0]  (!%p2293_p11), %s2507_s3, 2048, %s2297_s6, [#allocation6], %s2204_s12, %s2204_s12, %s2205_s13  }
  0x3e   : > { %s2354_s16 = sadd.s32 1, %s2198_s21   ;;  %s29_s23 = sadd.s32 1, %s2194_s20 }
  0x3f   : > { %s26_s17 = ssub.s32 %s2198_s21, %s2354_s16  ;;  %p36_p6 = scmp.ne.s32.totalorder %s2194_s20, %s2190_s19 }
  0x40   : > { %p27_p13 = scmp.eq.s32.totalorder %s26_s17, 0  ;;  %p37_p10 = scmp.eq.s32.totalorder %s2198_s21, 0 }
  0x41   : > { %p2517_p5 = scmp.eq.s32.totalorder %s2263_s22, 1  ;;  %p1788_p9 = scmp.lt.s32.totalorder %s2198_s21, 2 }
  0x42   : > { %s2363_s27 = scalar_select %p27_p13, %s2194_s20, %s29_s23  }
  0x43   : > { %p38_p3 = por %p37_p10, %p36_p6  ;;  %p2367_p7 = por %p2517_p5, %p36_p6 }
  0x44   : > { %s208_s30 = sand.u32 1, %s2194_s20   ;;  %s1723_s6 = sshll.u32 %s2198_s21, 11 }
  0x45   : > { %s2518_s29 = scalar_select %p2367_p7, 1, 0 }
  0x46   : > { %s1563_s7 = sshll.u32 %s208_s30, 7  ;;  %s2377_s10 = scalar_lea.hbm %s2504_s0, %s1723_s6 }
  0x47   : > { %s212_s11 = scalar_lea.vmem [#allocation2], %s1563_s7  ;;  %p2381_p11 = pnand %p1788_p9, %p38_p3 }
  0x48   : > { %s220_s28 = sshll.u32 %s212_s11, 4  ;;  %s2385_s14 = scalar_lea.sflag [#allocation3], %s208_s30  ;;  %s2379_s28 = int_to_ptr.vmem [resolvable:$true] %s220_s28 }
  0x49   : > { %s2098_s15 = scalar_lea.hbm %s2377_s10, 2048  ;;  %p2100_p0 = pneg %p2381_p11 }
  0x4a   : > { %p2099_p12 = scmp.ne.s32.totalorder %s2377_s10, %s2098_s15  ;;  %s2103_s7 = scalar_lea.hbm %s2504_s0, 4096 }
  0x4b   : > { %p2104_p13 = scmp.lt.u32.totalorder %s2377_s10, %s2504_s0  ;;  %p2105_p6 = scmp.lt.u32.totalorder %s2103_s7, %s2098_s15 }
  0x4c   : > { %p2101_p2 = pnand %p2100_p0, %p2099_p12  ;;  %p2107_p3 = scmp.lt.u32.totalorder %s2098_s15, %s2377_s10 }
  0x4d   : > { %p2106_p10 = por %p2105_p6, %p2104_p13 }
  0x4e   : > { %p2102_p1 = pneg %p2101_p2 }
  0x4f   : > { %p2108_p5 = por %p2107_p3, %p2106_p10 }
  0x51   : > { %p2109_p9 = pnand %p2108_p5, %p2102_p1 }
  0x53   : > { %2112 = shalt.err (!%p2109_p9)
}
  0x54   : > { %s2113_s30 = scalar_lea.vmem %s2379_s28, 2048  ;;  %s2206_s9 = smov [#allocation2]  }
  0x55   : > { %p2114_p12 = scmp.ne.s32.totalorder %s2379_s28, %s2113_s30  ;;  %s2118_s11 = sshll.u32 %s2206_s9, 4  ;;  %s2119_s11 = int_to_ptr.vmem [resolvable:$false] %s2118_s11 }
  0x56   : > { %s2120_s17 = scalar_lea.vmem %s2119_s11, 4096  ;;  %p2121_p4 = scmp.lt.s32.totalorder %s2379_s28, %s2119_s11 }
  0x57   : > { %p2116_p2 = pnand %p2114_p12, %p2100_p0  ;;  %p2122_p13 = scmp.lt.s32.totalorder %s2120_s17, %s2113_s30 }
  0x59   : > { %p2117_p7 = pneg %p2116_p2  ;;  %p2123_p6 = por %p2122_p13, %p2121_p4 }
  0x5b   : > { %p2124_p10 = pnand %p2123_p6, %p2117_p7 }
  0x5d   : > { %2127 = shalt.err (!%p2124_p10)
}
  0x5e   : > { %s2207_s15 = smov 1024   ;;  %232 = sbr.rel (%p2282_p8) target bundleno = 693 (0x2b5), region = 40 }
  0x5f   : > { %1781 = dma.hbm_to_vmem [thread:$0]  (!%p2381_p11), %s2377_s10, 2048, %s2379_s28, %s2385_s14, %s2207_s15, %s2207_s15, %s2204_s12  }
  0x60   : > { %s2417_s23 = sand.u32 (!%p2282_p8), 1, %s2190_s19   ;;  %p2520_p4 = scmp.ne.s32.totalorder (!%p2282_p8), %s2513_s24, 0 }
  0x61   : > { %s1568_s7 = sshll.u32 (!%p2282_p8), %s2417_s23, 7  ;;  %s235_s6 = scalar_lea.sflag (!%p2282_p8), [#allocation3], %s2417_s23 }
  0x62   : > { %s2421_s8 = scalar_lea.vmem (!%p2282_p8), [#allocation2], %s1568_s7 }
  0x65   : > { %2173 = dma.done.wait (%p2520_p4), %s235_s6, 2048  }
  0x66   : > { %2175 = vsyncadd (%p2520_p4), %s235_s6, 4294965248  ;;  %p2521_p7 = scmp.eq.s32.totalorder %s2263_s22, 0 }
  0x68   : > { %2177 = dma.done.wait (%p2521_p7), [#allocation6], 18432   ;;  %p2522_p8 = pmov %p2521_p7 }
  0x69   : > { %v1834_v0 = vld [vmem:[#allocation5 + $0x4] ss:$8 sps:$4 sm:$0xff]   ;;  %v1838_v2 = vld [vmem:[#allocation5] ss:$8 sps:$4 sm:$0xff]   ;;  %v1840_v4 = vld [vmem:[#allocation5 + $0x14] ss:$8 sps:$4 sm:$0xff]  }
  0x6a   : > { %2179 = vsyncadd (%p2522_p8), [#allocation6], 4294948864  ;;  %v1836_v1 = vld [vmem:[#allocation5 + $0x204] ss:$8 sps:$4 sm:$0xff]   ;;  %1068 = vmatprep.subr.bf16.mxu1 %v1834_v0  ;;  %v1839_v3 = vld [vmem:[#allocation5 + $0x200] ss:$8 sps:$4 sm:$0xff]  }
  0x6b   : > { %1154 = vmatprep.subr.bf16.mxu0 %v1836_v1  ;;  %1069 = vmatpush1.bf16.msra.mxu1 %v1838_v2  ;;  %v1842_v5 = vld [vmem:[#allocation5 + $0x214] ss:$8 sps:$4 sm:$0xff]   ;;  %v1844_v6 = vld [vmem:[#allocation5 + $0x10] ss:$8 sps:$4 sm:$0xff]   ;;  %v1846_v8 = vld [vmem:[#allocation5 + $0x24] ss:$8 sps:$4 sm:$0xff]  }
  0x6c   : > { %1155 = vmatpush1.bf16.msra.mxu0 %v1839_v3  ;;  %1070 = vmatprep.subr.bf16.mxu1 %v1840_v4  ;;  %v1845_v7 = vld [vmem:[#allocation5 + $0x210] ss:$8 sps:$4 sm:$0xff]   ;;  %v1848_v9 = vld [vmem:[#allocation5 + $0x224] ss:$8 sps:$4 sm:$0xff]   ;;  %v1850_v10 = vld [vmem:[#allocation5 + $0x20] ss:$8 sps:$4 sm:$0xff]  }
  0x6d   : > { %1156 = vmatprep.subr.bf16.mxu0 %v1842_v5  ;;  %v1851_v11 = vld [vmem:[#allocation5 + $0x220] ss:$8 sps:$4 sm:$0xff]   ;;  %v1852_v12 = vld [vmem:[#allocation5 + $0x34] ss:$8 sps:$4 sm:$0xff]   ;;  %v1856_v14 = vld [vmem:[#allocation5 + $0x30] ss:$8 sps:$4 sm:$0xff]  }
  0x6e   : > { %v1854_v13 = vld [vmem:[#allocation5 + $0x234] ss:$8 sps:$4 sm:$0xff]   ;;  %v1857_v15 = vld [vmem:[#allocation5 + $0x230] ss:$8 sps:$4 sm:$0xff]   ;;  %v1858_v16 = vld [vmem:[#allocation5 + $0x44] ss:$8 sps:$4 sm:$0xff]  }
  0x6f   : > { %1071 = vmatpush1.bf16.msra.mxu1 %v1844_v6  ;;  %v1860_v17 = vld [vmem:[#allocation5 + $0x244] ss:$8 sps:$4 sm:$0xff]   ;;  %v1862_v18 = vld [vmem:[#allocation5 + $0x40] ss:$8 sps:$4 sm:$0xff]   ;;  %v1864_v20 = vld [vmem:[#allocation5 + $0x54] ss:$8 sps:$4 sm:$0xff]  }
  0x70   : > { %1157 = vmatpush1.bf16.msra.mxu0 %v1845_v7  ;;  %1072 = vmatprep.subr.bf16.mxu1 %v1846_v8  ;;  %v1863_v19 = vld [vmem:[#allocation5 + $0x240] ss:$8 sps:$4 sm:$0xff]   ;;  %v1866_v21 = vld [vmem:[#allocation5 + $0x254] ss:$8 sps:$4 sm:$0xff]   ;;  %v1868_v22 = vld [vmem:[#allocation5 + $0x50] ss:$8 sps:$4 sm:$0xff]  }
  0x71   : > { %1158 = vmatprep.subr.bf16.mxu0 %v1848_v9  ;;  %v1869_v23 = vld [vmem:[#allocation5 + $0x250] ss:$8 sps:$4 sm:$0xff]   ;;  %v1870_v24 = vld [vmem:[#allocation5 + $0x64] ss:$8 sps:$4 sm:$0xff]   ;;  %v1874_v26 = vld [vmem:[#allocation5 + $0x60] ss:$8 sps:$4 sm:$0xff]  }
  0x72   : > { %v1872_v25 = vld [vmem:[#allocation5 + $0x264] ss:$8 sps:$4 sm:$0xff]   ;;  %v1875_v27 = vld [vmem:[#allocation5 + $0x260] ss:$8 sps:$4 sm:$0xff]   ;;  %v1876_v28 = vld [vmem:[#allocation5 + $0x74] ss:$8 sps:$4 sm:$0xff]  }
  0x73   : > { %1073 = vmatpush1.bf16.msra.mxu1 %v1850_v10  ;;  %v1878_v29 = vld [vmem:[#allocation5 + $0x274] ss:$8 sps:$4 sm:$0xff]   ;;  %v1880_v30 = vld [vmem:[#allocation5 + $0x70] ss:$8 sps:$4 sm:$0xff]   ;;  %v1882_v32 = vld [vmem:[#allocation5 + $0x84] ss:$8 sps:$4 sm:$0xff]  }
  0x74   : > { %1159 = vmatpush1.bf16.msra.mxu0 %v1851_v11  ;;  %1074 = vmatprep.subr.bf16.mxu1 %v1852_v12  ;;  %v1881_v31 = vld [vmem:[#allocation5 + $0x270] ss:$8 sps:$4 sm:$0xff]   ;;  %v1884_v33 = vld [vmem:[#allocation5 + $0x284] ss:$8 sps:$4 sm:$0xff]   ;;  %v1886_v34 = vld [vmem:[#allocation5 + $0x80] ss:$8 sps:$4 sm:$0xff]  }
  0x75   : > { %1160 = vmatprep.subr.bf16.mxu0 %v1854_v13  ;;  %v1887_v35 = vld [vmem:[#allocation5 + $0x280] ss:$8 sps:$4 sm:$0xff]   ;;  %v1888_v36 = vld [vmem:[#allocation5 + $0x94] ss:$8 sps:$4 sm:$0xff]   ;;  %v1892_v38 = vld [vmem:[#allocation5 + $0x90] ss:$8 sps:$4 sm:$0xff]  }
  0x76   : > { %v1890_v37 = vld [vmem:[#allocation5 + $0x294] ss:$8 sps:$4 sm:$0xff]   ;;  %v1893_v39 = vld [vmem:[#allocation5 + $0x290] ss:$8 sps:$4 sm:$0xff]   ;;  %v1894_v40 = vld [vmem:[#allocation5 + $0xa4] ss:$8 sps:$4 sm:$0xff]  }
  0x77   : > { %1075 = vmatpush1.bf16.msra.mxu1 %v1856_v14  ;;  %v1896_v41 = vld [vmem:[#allocation5 + $0x2a4] ss:$8 sps:$4 sm:$0xff]   ;;  %v1898_v42 = vld [vmem:[#allocation5 + $0xa0] ss:$8 sps:$4 sm:$0xff]   ;;  %v1900_v44 = vld [vmem:[#allocation5 + $0xb4] ss:$8 sps:$4 sm:$0xff]  }
  0x78   : > { %1161 = vmatpush1.bf16.msra.mxu0 %v1857_v15  ;;  %1076 = vmatprep.subr.bf16.mxu1 %v1858_v16  ;;  %v1899_v43 = vld [vmem:[#allocation5 + $0x2a0] ss:$8 sps:$4 sm:$0xff]   ;;  %v1902_v45 = vld [vmem:[#allocation5 + $0x2b4] ss:$8 sps:$4 sm:$0xff]   ;;  %v1904_v46 = vld [vmem:[#allocation5 + $0xb0] ss:$8 sps:$4 sm:$0xff]  }
  0x79   : > { %1162 = vmatprep.subr.bf16.mxu0 %v1860_v17  ;;  %v1905_v47 = vld [vmem:[#allocation5 + $0x2b0] ss:$8 sps:$4 sm:$0xff]   ;;  %v277_v48 = vld [vmem:[%s2421_s8 + $0x8] sm:$0xff]  ;;  %v1912_v58 = vld [vmem:[#allocation5 + $0xd4] ss:$8 sps:$4 sm:$0xff]   ;;  %s1571_s12 = sshll.u32 %s2417_s23, 4 }
  0x7a   : > { %v285_v49 = vld [vmem:[%s2421_s8 + $0x48] sm:$0xff]  ;;  %v1914_v59 = vld [vmem:[#allocation5 + $0x2d4] ss:$8 sps:$4 sm:$0xff]   ;;  %v1916_v60 = vld [vmem:[#allocation5 + $0xd0] ss:$8 sps:$4 sm:$0xff]   ;;  %s272_s13 = scalar_lea.vmem [#allocation8], %s1571_s12 }
  0x7b   : > { %1077 = vmatpush1.bf16.msra.mxu1 %v1862_v18  ;;  %v1906_v50 = vld [vmem:[#allocation5 + $0xc4] ss:$8 sps:$4 sm:$0xff]   ;;  %v293_v52 = vpack.c.bf16 %v285_v49, %v277_v48  ;;  %v1910_v56 = vld [vmem:[#allocation5 + $0xc0] ss:$8 sps:$4 sm:$0xff]   ;;  %v1917_v61 = vld [vmem:[#allocation5 + $0x2d0] ss:$8 sps:$4 sm:$0xff]  }
  0x7c   : > { %1163 = vmatpush1.bf16.msra.mxu0 %v1863_v19  ;;  %1078 = vmatprep.subr.bf16.mxu1 %v1864_v20  ;;  %v1908_v51 = vld [vmem:[#allocation5 + $0x2c4] ss:$8 sps:$4 sm:$0xff]   ;;  %v1911_v57 = vld [vmem:[#allocation5 + $0x2c0] ss:$8 sps:$4 sm:$0xff]   ;;  %v1924_v2 = vld [vmem:[#allocation5 + $0xf4] ss:$8 sps:$4 sm:$0xff]  }
  0x7d   : > { %1164 = vmatprep.subr.bf16.mxu0 %v1866_v21  ;;  %v281_v53 = vld [vmem:[%s2421_s8 + $0x28] sm:$0xff]  ;;  %1100 = vmatprep.mubr.bf16.mxu1 %v293_v52  ;;  %v1926_v3 = vld [vmem:[#allocation5 + $0x2f4] ss:$8 sps:$4 sm:$0xff]   ;;  %v1928_v4 = vld [vmem:[#allocation5 + $0xf0] ss:$8 sps:$4 sm:$0xff]   ;;  %s1466_s14 = sshll.u32 %s272_s13, 4  ;;  %s2455_s14 = int_to_ptr.vmem [resolvable:$true] %s1466_s14 }
  0x7e   : > { %v289_v54 = vld [vmem:[%s2421_s8 + $0x68] sm:$0xff]  ;;  %v1929_v5 = vld [vmem:[#allocation5 + $0x2f0] ss:$8 sps:$4 sm:$0xff]   ;;  %v276_v6 = vld [vmem:[%s2421_s8] sm:$0xff]  ;;  %s1724_s30 = sshll.u32 %s2263_s22, 8  ;;  %s1453_s15 = scalar_lea.sflag [#allocation4], %s2417_s23 }
  0x7f   : > { %1079 = vmatpush1.bf16.msra.mxu1 %v1868_v22  ;;  %v297_v55 = vpack.c.bf16 %v289_v54, %v281_v53  ;;  %v1918_v62 = vld [vmem:[#allocation5 + $0xe4] ss:$8 sps:$4 sm:$0xff]   ;;  %v1922_v0 = vld [vmem:[#allocation5 + $0xe0] ss:$8 sps:$4 sm:$0xff]   ;;  %v1938_v16 = vld [vmem:[#allocation5 + $0x114] ss:$8 sps:$4 sm:$0xff]   ;;  %s2460_s17 = scalar_lea.hbm %s2509_s5, %s1724_s30 }
  0x80   : > { %1165 = vmatpush1.bf16.msra.mxu0 %v1869_v23  ;;  %1080 = vmatprep.subr.bf16.mxu1 %v1870_v24  ;;  %v1920_v63 = vld [vmem:[#allocation5 + $0x2e4] ss:$8 sps:$4 sm:$0xff]   ;;  %v1923_v1 = vld [vmem:[#allocation5 + $0x2e0] ss:$8 sps:$4 sm:$0xff]   ;;  %v1941_v17 = vld [vmem:[#allocation5 + $0x314] ss:$8 sps:$4 sm:$0xff]  }
  0x81   : > { %1166 = vmatprep.subr.bf16.mxu0 %v1872_v25  ;;  %1186 = vmatprep.mubr.bf16.mxu0 %v297_v55  ;;  %v1932_v7 = vld [vmem:[#allocation5 + $0x104] ss:$8 sps:$4 sm:$0xff]   ;;  %v1930_v12 = vld [vmem:[#allocation5 + $0x100] ss:$8 sps:$4 sm:$0xff]   ;;  %v1936_v18 = vld [vmem:[#allocation5 + $0x110] ss:$8 sps:$4 sm:$0xff]  }
  0x82   : > { %v284_v8 = vld [vmem:[%s2421_s8 + $0x40] sm:$0xff]  ;;  %v1939_v19 = vld [vmem:[#allocation5 + $0x310] ss:$8 sps:$4 sm:$0xff]   ;;  %v1950_v24 = vld [vmem:[#allocation5 + $0x134] ss:$8 sps:$4 sm:$0xff]   ;;  %s2128_s7 = scalar_lea.vmem %s2455_s14, 256 }
  0x83   : > { %1081 = vmatpush1.bf16.msra.mxu1 %v1874_v26  ;;  %v280_v9 = vld [vmem:[%s2421_s8 + $0x20] sm:$0xff]  ;;  %v292_v14 = vpack.c.bf16 %v284_v8, %v276_v6  ;;  %v1953_v25 = vld [vmem:[#allocation5 + $0x334] ss:$8 sps:$4 sm:$0xff]   ;;  %v1948_v26 = vld [vmem:[#allocation5 + $0x130] ss:$8 sps:$4 sm:$0xff]   ;;  %p2129_p11 = scmp.ne.s32.totalorder %s2455_s14, %s2128_s7  ;;  %p2523_p0 = scmp.ne.s32.totalorder %s2518_s29, 0 }
  0x84   : > { %1167 = vmatpush1.bf16.msra.mxu0 %v1875_v27  ;;  %1082 = vmatprep.subr.bf16.mxu1 %v1876_v28  ;;  %v288_v10 = vld [vmem:[%s2421_s8 + $0x60] sm:$0xff]  ;;  %v1951_v27 = vld [vmem:[#allocation5 + $0x330] ss:$8 sps:$4 sm:$0xff]   ;;  %v1986_v54 = vld [vmem:[#allocation5 + $0x194] ss:$8 sps:$4 sm:$0xff]   ;;  %s2209_s22 = smov [#allocation8]  }
  0x85   : > { %1168 = vmatprep.subr.bf16.mxu0 %v1878_v29  ;;  %v1935_v11 = vld [vmem:[#allocation5 + $0x304] ss:$8 sps:$4 sm:$0xff]   ;;  %v1933_v13 = vld [vmem:[#allocation5 + $0x300] ss:$8 sps:$4 sm:$0xff]   ;;  %v296_v15 = vpack.c.bf16 %v288_v10, %v280_v9  ;;  %v1975_v49 = vld [vmem:[#allocation5 + $0x370] ss:$8 sps:$4 sm:$0xff]   ;;  %p2130_p1 = pnand %p2129_p11, %p2523_p0 }
  0x86   : > { %v1944_v20 = vld [vmem:[#allocation5 + $0x124] ss:$8 sps:$4 sm:$0xff]   ;;  %v1942_v22 = vld [vmem:[#allocation5 + $0x120] ss:$8 sps:$4 sm:$0xff]   ;;  %v1989_v55 = vld [vmem:[#allocation5 + $0x394] ss:$8 sps:$4 sm:$0xff]  }
  0x87   : > { %1083 = vmatpush1.bf16.msra.mxu1 %v1880_v30  ;;  %v1947_v21 = vld [vmem:[#allocation5 + $0x324] ss:$8 sps:$4 sm:$0xff]   ;;  %v1945_v23 = vld [vmem:[#allocation5 + $0x320] ss:$8 sps:$4 sm:$0xff]   ;;  %v2010_v6 = vld [vmem:[#allocation5 + $0x1d4] ss:$8 sps:$4 sm:$0xff]   ;;  %p2131_p3 = pneg %p2130_p1 }
  0x88   : > { %1169 = vmatpush1.bf16.msra.mxu0 %v1881_v31  ;;  %1084 = vmatprep.subr.bf16.mxu1 %v1882_v32  ;;  %v1956_v28 = vld [vmem:[#allocation5 + $0x144] ss:$8 sps:$4 sm:$0xff]   ;;  %v1954_v30 = vld [vmem:[#allocation5 + $0x140] ss:$8 sps:$4 sm:$0xff]   ;;  %v1962_v32 = vld [vmem:[#allocation5 + $0x154] ss:$8 sps:$4 sm:$0xff]  }
  0x89   : > { %1170 = vmatprep.subr.bf16.mxu0 %v1884_v33  ;;  %v1959_v29 = vld [vmem:[#allocation5 + $0x344] ss:$8 sps:$4 sm:$0xff]   ;;  %v1957_v31 = vld [vmem:[#allocation5 + $0x340] ss:$8 sps:$4 sm:$0xff]   ;;  %v1965_v33 = vld [vmem:[#allocation5 + $0x354] ss:$8 sps:$4 sm:$0xff]  }
  0x8a   : > { %v1978_v52 = vld [vmem:[#allocation5 + $0x180] ss:$8 sps:$4 sm:$0xff]   ;;  %v2008_v8 = vld [vmem:[#allocation5 + $0x1d0] ss:$8 sps:$4 sm:$0xff]   ;;  %v2016_v10 = vld [vmem:[#allocation5 + $0x1e4] ss:$8 sps:$4 sm:$0xff]  }
  0x8b   : > { %1085 = vmatpush1.bf16.msra.mxu1 %v1886_v34  ;;  %v1960_v34 = vld [vmem:[#allocation5 + $0x150] ss:$8 sps:$4 sm:$0xff]   ;;  %v1981_v53 = vld [vmem:[#allocation5 + $0x380] ss:$8 sps:$4 sm:$0xff]   ;;  %s2132_s6 = sshll.u32 %s2209_s22, 4  ;;  %s2133_s6 = int_to_ptr.vmem [resolvable:$false] %s2132_s6 }
  0x8c   : > { %1171 = vmatpush1.bf16.msra.mxu0 %v1887_v35  ;;  %1086 = vmatprep.subr.bf16.mxu1 %v1888_v36  ;;  %v1963_v35 = vld [vmem:[#allocation5 + $0x350] ss:$8 sps:$4 sm:$0xff]   ;;  %v1968_v36 = vld [vmem:[#allocation5 + $0x164] ss:$8 sps:$4 sm:$0xff]   ;;  %p2135_p5 = scmp.lt.s32.totalorder %s2455_s14, %s2133_s6 }
  0x8d   : > { %1172 = vmatprep.subr.bf16.mxu0 %v1890_v37  ;;  %v1971_v37 = vld [vmem:[#allocation5 + $0x364] ss:$8 sps:$4 sm:$0xff]   ;;  %v2011_v9 = vld [vmem:[#allocation5 + $0x3d0] ss:$8 sps:$4 sm:$0xff]  }
  0x8f   : > { %1087 = vmatpush1.bf16.msra.mxu1 %v1892_v38  ;;  %v1966_v38 = vld [vmem:[#allocation5 + $0x160] ss:$8 sps:$4 sm:$0xff]  }
  0x90   : > { %1173 = vmatpush1.bf16.msra.mxu0 %v1893_v39  ;;  %1088 = vmatprep.subr.bf16.mxu1 %v1894_v40  ;;  %v1969_v39 = vld [vmem:[#allocation5 + $0x360] ss:$8 sps:$4 sm:$0xff]   ;;  %v279_v40 = vld [vmem:[%s2421_s8 + $0x18] sm:$0xff] }
  0x91   : > { %1174 = vmatprep.subr.bf16.mxu0 %v1896_v41  ;;  %v287_v41 = vld [vmem:[%s2421_s8 + $0x58] sm:$0xff] }
  0x93   : > { %1089 = vmatpush1.bf16.msra.mxu1 %v1898_v42  ;;  %v283_v42 = vld [vmem:[%s2421_s8 + $0x38] sm:$0xff] }
  0x94   : > { %1175 = vmatpush1.bf16.msra.mxu0 %v1899_v43  ;;  %1090 = vmatprep.subr.bf16.mxu1 %v1900_v44  ;;  %v1974_v43 = vld [vmem:[#allocation5 + $0x174] ss:$8 sps:$4 sm:$0xff]  }
  0x95   : > { %1176 = vmatprep.subr.bf16.mxu0 %v1902_v45  ;;  %v1977_v44 = vld [vmem:[#allocation5 + $0x374] ss:$8 sps:$4 sm:$0xff]   ;;  %v295_v45 = vpack.c.bf16 %v287_v41, %v279_v40  ;;  %v1244_v40 = vlaneseq }
  0x97   : > { %1091 = vmatpush1.bf16.msra.mxu1 %v1904_v46  ;;  %v291_v46 = vld [vmem:[%s2421_s8 + $0x78] sm:$0xff]  ;;  %v1245_v41 = vshrl.u32 %v1244_v40, 7 }
  0x98   : > { %1177 = vmatpush1.bf16.msra.mxu0 %v1905_v47  ;;  %1092 = vmatprep.subr.bf16.mxu1 %v1906_v50  ;;  %v1972_v47 = vld [vmem:[#allocation5 + $0x170] ss:$8 sps:$4 sm:$0xff]   ;;  %v299_v48 = vpack.c.bf16 %v291_v46, %v283_v42  ;;  %v1980_v50 = vld [vmem:[#allocation5 + $0x184] ss:$8 sps:$4 sm:$0xff]  }
  0x99   : > { %1178 = vmatprep.subr.bf16.mxu0 %v1908_v51  ;;  %v1983_v51 = vld [vmem:[#allocation5 + $0x384] ss:$8 sps:$4 sm:$0xff]   ;;  %v1246_v42 = vsub.s32 0, %v1245_v41 }
  0x9b   : > { %1093 = vmatpush1.bf16.msra.mxu1 %v1910_v56  ;;  %v1984_v56 = vld [vmem:[#allocation5 + $0x190] ss:$8 sps:$4 sm:$0xff]  }
  0x9c   : > { %1179 = vmatpush1.bf16.msra.mxu0 %v1911_v57  ;;  %1094 = vmatprep.subr.bf16.mxu1 %v1912_v58  ;;  %v1987_v57 = vld [vmem:[#allocation5 + $0x390] ss:$8 sps:$4 sm:$0xff]   ;;  %v1992_v58 = vld [vmem:[#allocation5 + $0x1a4] ss:$8 sps:$4 sm:$0xff]  }
  0x9d   : > { %1180 = vmatprep.subr.bf16.mxu0 %v1914_v59  ;;  %v1995_v59 = vld [vmem:[#allocation5 + $0x3a4] ss:$8 sps:$4 sm:$0xff]  }
  0x9f   : > { %1095 = vmatpush1.bf16.msra.mxu1 %v1916_v60  ;;  %v1990_v60 = vld [vmem:[#allocation5 + $0x1a0] ss:$8 sps:$4 sm:$0xff]  }
  0xa0   : > { %1181 = vmatpush1.bf16.msra.mxu0 %v1917_v61  ;;  %1096 = vmatprep.subr.bf16.mxu1 %v1918_v62  ;;  %v1993_v61 = vld [vmem:[#allocation5 + $0x3a0] ss:$8 sps:$4 sm:$0xff]   ;;  %v1998_v62 = vld [vmem:[#allocation5 + $0x1b4] ss:$8 sps:$4 sm:$0xff]  }
  0xa1   : > { %1182 = vmatprep.subr.bf16.mxu0 %v1920_v63  ;;  %v2001_v63 = vld [vmem:[#allocation5 + $0x3b4] ss:$8 sps:$4 sm:$0xff]  }
  0xa3   : > { %1097 = vmatpush1.bf16.msra.mxu1 %v1922_v0  ;;  %v1996_v0 = vld [vmem:[#allocation5 + $0x1b0] ss:$8 sps:$4 sm:$0xff]  }
  0xa4   : > { %1183 = vmatpush1.bf16.msra.mxu0 %v1923_v1  ;;  %1098 = vmatprep.subr.bf16.mxu1 %v1924_v2  ;;  %v1999_v1 = vld [vmem:[#allocation5 + $0x3b0] ss:$8 sps:$4 sm:$0xff]   ;;  %v2004_v2 = vld [vmem:[#allocation5 + $0x1c4] ss:$8 sps:$4 sm:$0xff]  }
  0xa5   : > { %1184 = vmatprep.subr.bf16.mxu0 %v1926_v3  ;;  %v2007_v3 = vld [vmem:[#allocation5 + $0x3c4] ss:$8 sps:$4 sm:$0xff]  }
  0xa7   : > { %1099 = vmatpush1.bf16.msra.mxu1 %v1928_v4  ;;  %v2002_v4 = vld [vmem:[#allocation5 + $0x1c0] ss:$8 sps:$4 sm:$0xff]  }
  0xa8   : > { %1185 = vmatpush1.bf16.msra.mxu0 %v1929_v5  ;;  %1111 = vmatprep.subr.bf16.mxu1 %v1932_v7  ;;  %v2005_v5 = vld [vmem:[#allocation5 + $0x3c0] ss:$8 sps:$4 sm:$0xff]   ;;  %v2013_v7 = vld [vmem:[#allocation5 + $0x3d4] ss:$8 sps:$4 sm:$0xff]  }
  0xa9   : > { %1197 = vmatprep.subr.bf16.mxu0 %v1935_v11  ;;  %v2019_v11 = vld [vmem:[#allocation5 + $0x3e4] ss:$8 sps:$4 sm:$0xff]  }
  0xaa   : > { %1101 = vmatmul.mubr.bf16.vlgmr.msra.gmra.mrb[0].mxu1 %v292_v14  ;;  %v2022_v14 = vld [vmem:[#allocation5 + $0x1f4] ss:$8 sps:$4 sm:$0xff]  }
  0xab   : > { %1187 = vmatmul.mubr.bf16.vlgmr.msra.gmra.mrb[0].mxu0 %v296_v15  ;;  %1112 = vmatpush1.bf16.msra.mxu1 %v1930_v12  ;;  %v2014_v12 = vld [vmem:[#allocation5 + $0x1e0] ss:$8 sps:$4 sm:$0xff]   ;;  %v2025_v15 = vld [vmem:[#allocation5 + $0x3f4] ss:$8 sps:$4 sm:$0xff]  }
  0xac   : > { %1198 = vmatpush1.bf16.msra.mxu0 %v1933_v13  ;;  %1113 = vmatprep.subr.bf16.mxu1 %v1938_v16  ;;  %v2017_v13 = vld [vmem:[#allocation5 + $0x3e0] ss:$8 sps:$4 sm:$0xff]   ;;  %v2020_v16 = vld [vmem:[#allocation5 + $0x1f0] ss:$8 sps:$4 sm:$0xff]  }
  0xad   : > { %1199 = vmatprep.subr.bf16.mxu0 %v1941_v17  ;;  %1143 = vmatprep.mubr.bf16.mxu1 %v295_v45  ;;  %v2023_v17 = vld [vmem:[#allocation5 + $0x3f0] ss:$8 sps:$4 sm:$0xff]  }
  0xae   : > { %1229 = vmatprep.mubr.bf16.mxu0 %v299_v48 }
  0xaf   : > { %1114 = vmatpush1.bf16.msra.mxu1 %v1936_v18  ;;  %v278_v18 = vld [vmem:[%s2421_s8 + $0x10] sm:$0xff] }
  0xb0   : > { %1200 = vmatpush1.bf16.msra.mxu0 %v1939_v19  ;;  %1115 = vmatprep.subr.bf16.mxu1 %v1944_v20  ;;  %v286_v19 = vld [vmem:[%s2421_s8 + $0x50] sm:$0xff] }
  0xb1   : > { %1201 = vmatprep.subr.bf16.mxu0 %v1947_v21  ;;  %v282_v20 = vld [vmem:[%s2421_s8 + $0x30] sm:$0xff] }
  0xb2   : > { %v290_v21 = vld [vmem:[%s2421_s8 + $0x70] sm:$0xff]  ;;  %s2134_s8 = scalar_lea.vmem %s2133_s6, 512 }
  0xb3   : > { %1116 = vmatpush1.bf16.msra.mxu1 %v1942_v22  ;;  %v2026_v22 = vld [vmem:[#allocation7 + $0x40] sm:$0xff]   ;;  %p2136_p9 = scmp.lt.s32.totalorder %s2134_s8, %s2128_s7 }
  0xb4   : > { %1202 = vmatpush1.bf16.msra.mxu0 %v1945_v23  ;;  %1117 = vmatprep.subr.bf16.mxu1 %v1950_v24  ;;  %v294_v23 = vpack.c.bf16 %v286_v19, %v278_v18  ;;  %v298_v24 = vpack.c.bf16 %v290_v21, %v282_v20 }
  0xb5   : > { %1203 = vmatprep.subr.bf16.mxu0 %v1953_v25  ;;  %v2027_v25 = vld [vmem:[#allocation7] sm:$0xff]   ;;  %p2137_p12 = por %p2136_p9, %p2135_p5 }
  0xb7   : > { %1118 = vmatpush1.bf16.msra.mxu1 %v1948_v26  ;;  %v2028_v26 = vld [vmem:[#allocation7 + $0x48] sm:$0xff]   ;;  %p2138_p2 = pnand %p2137_p12, %p2131_p3 }
  0xb8   : > { %1204 = vmatpush1.bf16.msra.mxu0 %v1951_v27  ;;  %1119 = vmatprep.subr.bf16.mxu1 %v1956_v28  ;;  %v2029_v27 = vld [vmem:[#allocation7 + $0x8] sm:$0xff]   ;;  %v2030_v28 = vld [vmem:[#allocation7 + $0x50] sm:$0xff]  }
  0xb9   : > { %1205 = vmatprep.subr.bf16.mxu0 %v1959_v29  ;;  %v2031_v29 = vld [vmem:[#allocation7 + $0x10] sm:$0xff]  }
  0xbb   : > { %1120 = vmatpush1.bf16.msra.mxu1 %v1954_v30  ;;  %v2032_v30 = vld [vmem:[#allocation7 + $0x58] sm:$0xff]  }
  0xbc   : > { %1206 = vmatpush1.bf16.msra.mxu0 %v1957_v31  ;;  %1121 = vmatprep.subr.bf16.mxu1 %v1962_v32  ;;  %v2033_v31 = vld [vmem:[#allocation7 + $0x18] sm:$0xff]   ;;  %v2034_v32 = vld [vmem:[#allocation7 + $0x60] sm:$0xff]  }
  0xbd   : > { %1207 = vmatprep.subr.bf16.mxu0 %v1965_v33  ;;  %v2035_v33 = vld [vmem:[#allocation7 + $0x20] sm:$0xff]  }
  0xbf   : > { %1122 = vmatpush1.bf16.msra.mxu1 %v1960_v34  ;;  %v2036_v34 = vld [vmem:[#allocation7 + $0x68] sm:$0xff]  }
  0xc0   : > { %1208 = vmatpush1.bf16.msra.mxu0 %v1963_v35  ;;  %1123 = vmatprep.subr.bf16.mxu1 %v1968_v36  ;;  %v2037_v35 = vld [vmem:[#allocation7 + $0x28] sm:$0xff]   ;;  %v2038_v36 = vld [vmem:[#allocation7 + $0x70] sm:$0xff]  }
  0xc1   : > { %1209 = vmatprep.subr.bf16.mxu0 %v1971_v37  ;;  %v2039_v37 = vld [vmem:[#allocation7 + $0x30] sm:$0xff]  }
  0xc3   : > { %1124 = vmatpush1.bf16.msra.mxu1 %v1966_v38  ;;  %v2040_v38 = vld [vmem:[#allocation7 + $0x78] sm:$0xff]  }
  0xc4   : > { %1210 = vmatpush1.bf16.msra.mxu0 %v1969_v39  ;;  %1125 = vmatprep.subr.bf16.mxu1 %v1974_v43  ;;  %v2041_v39 = vld [vmem:[#allocation7 + $0x38] sm:$0xff]   ;;  %v1242_v43 = vld [vmem:[%s2506_s2] sm:$0x3] }
  0xc5   : > { %1211 = vmatprep.subr.bf16.mxu0 %v1977_v44  ;;  %v1250_v44 = vsub.s32 1, %v1245_v41  ;;  %v1247_v45 = vrot.slane %v1242_v43, %v1246_v42 }
  0xc7   : > { %1126 = vmatpush1.bf16.msra.mxu1 %v1972_v47  ;;  %v1251_v46 = vrot.slane %v1242_v43, %v1250_v44  ;;  %v1254_v47 = vpack.c.bf16 %v1247_v45, %v1247_v45 }
  0xc8   : > { %1212 = vmatpush1.bf16.msra.mxu0 %v1975_v49  ;;  %1127 = vmatprep.subr.bf16.mxu1 %v1980_v50 }
  0xc9   : > { %1213 = vmatprep.subr.bf16.mxu0 %v1983_v51  ;;  %v1255_v48 = vpack.c.bf16 %v1251_v46, %v1251_v46  ;;  %v1257_v49 = vpack.i.b16 %v1254_v47, %v1254_v47 }
  0xcb   : > { %1128 = vmatpush1.bf16.msra.mxu1 %v1978_v52  ;;  %v1264_v52 = vpack.i.b16 %v1255_v48, %v1255_v48 }
  0xcc   : > { %1214 = vmatpush1.bf16.msra.mxu0 %v1981_v53  ;;  %1129 = vmatprep.subr.bf16.mxu1 %v1986_v54 }
  0xcd   : > { %1215 = vmatprep.subr.bf16.mxu0 %v1989_v55 }
  0xcf   : > { %1130 = vmatpush1.bf16.msra.mxu1 %v1984_v56 }
  0xd0   : > { %1216 = vmatpush1.bf16.msra.mxu0 %v1987_v57  ;;  %1131 = vmatprep.subr.bf16.mxu1 %v1992_v58 }
  0xd1   : > { %1217 = vmatprep.subr.bf16.mxu0 %v1995_v59 }
  0xd3   : > { %1132 = vmatpush1.bf16.msra.mxu1 %v1990_v60  ;;  %v1262_v60 = vrot.slane %v1257_v49, %v1246_v42 }
  0xd4   : > { %1218 = vmatpush1.bf16.msra.mxu0 %v1993_v61  ;;  %1133 = vmatprep.subr.bf16.mxu1 %v1998_v62 }
  0xd5   : > { %1219 = vmatprep.subr.bf16.mxu0 %v2001_v63 }
  0xd7   : > { %1134 = vmatpush1.bf16.msra.mxu1 %v1996_v0  ;;  %v1269_v0 = vrot.slane %v1264_v52, %v1246_v42 }
  0xd8   : > { %1220 = vmatpush1.bf16.msra.mxu0 %v1999_v1  ;;  %1135 = vmatprep.subr.bf16.mxu1 %v2004_v2 }
  0xd9   : > { %1221 = vmatprep.subr.bf16.mxu0 %v2007_v3 }
  0xdb   : > { %1136 = vmatpush1.bf16.msra.mxu1 %v2002_v4 }
  0xdc   : > { %1222 = vmatpush1.bf16.msra.mxu0 %v2005_v5  ;;  %1137 = vmatprep.subr.bf16.mxu1 %v2010_v6  ;;  %v2208_v5 = vmov 0  }
  0xdd   : > { %1223 = vmatprep.subr.bf16.mxu0 %v2013_v7 }
  0xdf   : > { %1138 = vmatpush1.bf16.msra.mxu1 %v2008_v8 }
  0xe0   : > { %1224 = vmatpush1.bf16.msra.mxu0 %v2011_v9  ;;  %1139 = vmatprep.subr.bf16.mxu1 %v2016_v10  ;;  %v1700_v9 = vld [vmem:[%s2508_s4] ss:$0 sm:$0xff] }
  0xe1   : > { %1225 = vmatprep.subr.bf16.mxu0 %v2019_v11 }
  0xe3   : > { %1140 = vmatpush1.bf16.msra.mxu1 %v2014_v12 }
  0xe4   : > { %1226 = vmatpush1.bf16.msra.mxu0 %v2017_v13  ;;  %1141 = vmatprep.subr.bf16.mxu1 %v2022_v14 }
  0xe5   : > { %1227 = vmatprep.subr.bf16.mxu0 %v2025_v15 }
  0xe7   : > { %1142 = vmatpush1.bf16.msra.mxu1 %v2020_v16 }
  0xe8   : > { %1228 = vmatpush1.bf16.msra.mxu0 %v2023_v17  ;;  %1725 = vmatprep.subr.bf16.mxu1 %v2026_v22 }
  0xea   : > { %1144 = vmatmul.mubr.bf16.vlgmr.msra.gmra.mrb[0].mxu1 %v294_v23 }
  0xeb   : > { %1230 = vmatmul.mubr.bf16.vlgmr.msra.gmra.mrb[0].mxu0 %v298_v24  ;;  %1726 = vmatpush3.bf16.msra.mxu1 %v2027_v25 }
  0xec   : > { %1727 = vmatprep.subr.bf16.mxu1 %v2028_v26 }
  0xef   : > { %1728 = vmatpush3.bf16.msra.mxu1 %v2029_v27 }
  0xf0   : > { %1729 = vmatprep.subr.bf16.mxu1 %v2030_v28 }
  0xf3   : > { %1730 = vmatpush3.bf16.msra.mxu1 %v2031_v29 }
  0xf4   : > { %1731 = vmatprep.subr.bf16.mxu1 %v2032_v30 }
  0xf7   : > { %1732 = vmatpush3.bf16.msra.mxu1 %v2033_v31 }
  0xf8   : > { %1733 = vmatprep.subr.bf16.mxu1 %v2034_v32 }
  0xfb   : > { %1734 = vmatpush3.bf16.msra.mxu1 %v2035_v33 }
  0xfc   : > { %1735 = vmatprep.subr.bf16.mxu1 %v2036_v34 }
  0xff   : > { %1736 = vmatpush3.bf16.msra.mxu1 %v2037_v35 }
 0x100   : > { %1737 = vmatprep.subr.bf16.mxu1 %v2038_v36 }
 0x103   : > { %1738 = vmatpush3.bf16.msra.mxu1 %v2039_v37 }
 0x104   : > { %1739 = vmatprep.subr.bf16.mxu1 %v2040_v38 }
 0x107   : > { %1740 = vmatpush3.bf16.msra.mxu1 %v2041_v39 }
 0x1bd   : > { %v1145_v50 = vpop.f32.mrb[0].mxu1 }
 0x1be   : > { %v1231_v51 = vpop.f32.mrb[0].mxu0  ;;  %v1147_v54 = vpop.f32.mrb[1].mxu1 }
 0x1bf   : > { %v1747_v53 = vadd.f32 %v1231_v51, %v1145_v50  ;;  %v1233_v55 = vpop.f32.mrb[1].mxu0  ;;  %v1149_v57 = vpop.f32.mrb[2].mxu1 }
 0x1c0   : > { %v1748_v56 = vadd.f32 %v1233_v55, %v1147_v54  ;;  %v1235_v58 = vpop.f32.mrb[2].mxu0  ;;  %v1151_v61 = vpop.f32.mrb[3].mxu1 }
 0x1c1   : > { %v1749_v59 = vadd.f32 %v1235_v58, %v1149_v57  ;;  %v1237_v62 = vpop.f32.mrb[3].mxu0 }
 0x1c2   : > { %v1750_v63 = vadd.f32 %v1237_v62, %v1151_v61 }
 0x1c3   : > { %v1240_v1 = vpack.c.bf16 %v1749_v59, %v1747_v53 }
 0x1c4   : > { %v1241_v2 = vpack.c.bf16 %v1750_v63, %v1748_v56 }
 0x1c5   : > { %v1270_v3 = vadd.bf16 %v1262_v60, %v1240_v1 }
 0x1c6   : > { %v1271_v4 = vadd.bf16 %v1269_v0, %v1241_v2 }
 0x1c7   : > { %v1272_v7 = vmax.bf16 %v2208_v5, %v1270_v3 }
 0x1c8   : > { %v1273_v6 = vmax.bf16 %v2208_v5, %v1271_v4 }
 0x1ca   : > { %1441 = vmatprep.mubr.bf16.mxu1 %v1273_v6 }
 0x1cb   : > { %1442 = vmatmul.mubr.bf16.vlgmr.msra.gmra.mrb[4].mxu1 %v1272_v7 }
 0x29e   : > { %v1741_v8 = vpop.f32.mrb[4].mxu1 }
 0x29f   : > { %v1742_v10 = vpop.f32.mrb[5].mxu1 }
 0x2a0   : > { %v1743_v11 = vadd.f32 %v1742_v10, %v1741_v8  ;;  %v1744_v12 = vpop.f32.mrb[6].mxu1 }
 0x2a1   : > { %v1745_v13 = vpop.f32.mrb[7].mxu1 }
 0x2a2   : > { %v1444_v14 = vadd.f32 %v1743_v11, %v1700_v9  ;;  %v1746_v15 = vadd.f32 %v1745_v13, %v1744_v12 }
 0x2a4   : > { %1450 = vst [vmem:[%s272_s13] sm:$0xff] %v1444_v14  ;;  %v1447_v16 = vadd.f32 %v1746_v15, %v1700_v9 }
 0x2a6   : > { %1451 = vst [vmem:[%s272_s13 + $0x8] sm:$0xff] %v1447_v16 }
 0x2a7   : > { %2141 = shalt.err (!%p2138_p2)
}
 0x2a8   : > { %s2142_s24 = scalar_lea.hbm %s2460_s17, 256  ;;  %s2146_s10 = scalar_lea.hbm %s2509_s5, 512 }
 0x2a9   : > { %p2143_p13 = scmp.ne.s32.totalorder %s2460_s17, %s2142_s24  ;;  %p2147_p4 = scmp.lt.u32.totalorder %s2460_s17, %s2509_s5 }
 0x2aa   : > { %p2148_p7 = scmp.lt.u32.totalorder %s2146_s10, %s2142_s24  ;;  %p2150_p11 = scmp.lt.u32.totalorder %s2142_s24, %s2460_s17 }
 0x2ab   : > { %p2144_p6 = pnand %p2143_p13, %p2523_p0 }
 0x2ac   : > { %p2149_p8 = por %p2148_p7, %p2147_p4 }
 0x2ad   : > { %p2145_p10 = pneg %p2144_p6 }
 0x2ae   : > { %p2151_p1 = por %p2150_p11, %p2149_p8 }
 0x2b0   : > { %p2152_p3 = pnand %p2151_p1, %p2145_p10 }
 0x2b2   : > { %2155 = shalt.err (!%p2152_p3)
}
 0x2b3   : > { %s2210_s30 = smov 128   ;;  %s2211_s9 = smov 8  }
 0x2b4   : > { %1769 = dma.vmem_to_hbm [thread:$0]  (%p2523_p0), %s2455_s14, 256, %s2460_s17, %s1453_s15, %s2210_s30, %s2210_s30, %s2211_s9  }
 0x2b5 PF: > { %s1481_s11 = sand.u32 1, %s2186_s18   ;;  %p2524_p5 = scmp.ne.s32.totalorder %s2514_s25, 0 }
 0x2b6   : > { %p2525_p9 = scmp.ge.s32.totalorder %s2198_s21, 2  ;;  %s1482_s7 = scalar_lea.sflag [#allocation4], %s1481_s11 }
 0x2b8   : > { %p1783_p12 = pnand %p2525_p9, %p2524_p5 }
 0x2ba   : > { %2181 = dma.done.wait (!%p1783_p12), %s1482_s7, 256  }
 0x2bb   : > { %2183 = vsyncadd (!%p1783_p12), %s1482_s7, 4294967040  ;;  %p19_p2 = scmp.ge.s32.totalorder %s2354_s16, 4   ;;  %s2526_s18 = smov %s2190_s19 }
 0x2bc   : > { %s2527_s19 = smov %s2194_s20  ;;  %s2528_s20 = smov %s2363_s27 }
 0x2bd   : > { %s2529_s21 = smov %s2354_s16  ;;  %21 = sbr.rel (!%p19_p2) target bundleno = 6 (0x6), region = 93 }
 0x2c4   :  { %1487 = vsyncpa [#allocation3], 1 }
 0x2c5   :  { %1489 = vsyncpa [#allocation3 + $0x1], 1 }
 0x2c6   :  { %1490 = vsyncpa [#allocation6], 1 }
 0x2c7   :  { %1491 = vsyncpa [#allocation4], 1 }
 0x2c8   :  { %1493 = vsyncpa [#allocation4 + $0x1], 1 }

// kernel: tpu_custom_call.1
= control target key start
LH: loop header
LB: loop body
LE: loop exit
PB: predicated region body
PF: predicated region fallthrough
CT: control target
= control target key end

     0   :  { %10 = vsyncpa [#allocation3], 0  ;;  %s2504_s0 = inlined_call_operand.hbm [shape: f32[32,1024], index: 0, kind: input, shape index: {}]   ;;  %s2505_s1 = inlined_call_operand.hbm [shape: bf16[1024,256], index: 1, kind: input, shape index: {}]   ;;  %s2506_s2 = inlined_call_operand.vmem [shape: f32[1,256], index: 2, kind: input, shape index: {}]   ;;  %s2507_s3 = inlined_call_operand.hbm [shape: bf16[256,128], index: 3, kind: input, shape index: {}]   ;;  %s2508_s4 = inlined_call_operand.vmem [shape: f32[1,128], index: 4, kind: input, shape index: {}]   ;;  %s2509_s5 = inlined_call_operand.hbm [shape: f32[32,128], index: 5, kind: output, shape index: {}]  }
   0x1   :  { %12 = vsyncpa [#allocation3 + $0x1], 0 }
   0x2   :  { %13 = vsyncpa [#allocation6], 0 }
   0x3   :  { %14 = vsyncpa [#allocation4], 0 }
   0x4   :  { %16 = vsyncpa [#allocation4 + $0x1], 0  ;;  %s2242_s18 = smov 0   ;;  %s2244_s19 = smov 0  }
   0x5   :  { %s2246_s20 = smov 0   ;;  %s2248_s21 = smov 0  }
   0x6 LB: > { %s2263_s22 = sadd.s32 4294967295, %s2198_s21   ;;  %s1558_s23 = sadd.s32 4294967294, %s2198_s21   ;;  %s2198_s21 = sphi %s2248_s21, %s2529_s21   ;;  %s2194_s20 = sphi %s2246_s20, %s2528_s20   ;;  %s2190_s19 = sphi %s2244_s19, %s2527_s19   ;;  %s2186_s18 = sphi %s2242_s18, %s2526_s18  }
   0x7   : > { %p42_p0 = scmp.ne.s32.totalorder %s2190_s19, %s2186_s18  ;;  %p2510_p1 = scmp.eq.s32.totalorder %s2263_s22, 0 }
   0x8   : > { %p156_p3 = scmp.eq.s32.totalorder %s1558_s23, 1  ;;  %p1559_p5 = scmp.ge.s32.totalorder %s2198_s21, 1 }
   0x9   : > { %p2272_p4 = por %p2510_p1, %p42_p0  ;;  %p163_p7 = scmp.lt.s32.totalorder %s2198_s21, 3 }
   0xa   : > { %p2277_p6 = por %p156_p3, %p42_p0  ;;  %s2200_s27 = smov [#allocation5]  }
   0xb   : > { %s2513_s24 = scalar_select %p2272_p4, 1, 0 }
   0xc   : > { %s2514_s25 = scalar_select %p2277_p6, 1, 0 }
   0xd   : > { %p2282_p8 = pnand %p1559_p5, %p163_p7  ;;  %s175_s28 = sshll.u32 %s2200_s27, 4  ;;  %s2286_s28 = int_to_ptr.vmem [resolvable:$true] %s175_s28 }
   0xe   : > { %s2201_s30 = smov [#allocation7]   ;;  %s2042_s9 = scalar_lea.hbm %s2505_s1, 16384 }
   0xf   : > { %p1771_p9 = pneg %p2282_p8  ;;  %s191_s6 = sshll.u32 %s2201_s30, 4  ;;  %s2297_s6 = int_to_ptr.vmem [resolvable:$true] %s191_s6 }
  0x10   : > { %p2043_p12 = scmp.ne.s32.totalorder %s2505_s1, %s2042_s9  ;;  %p2049_p5 = scmp.lt.u32.totalorder %s2042_s9, %s2505_s1 }
  0x11   : > { %p2293_p11 = pnand %p1771_p9, %p2510_p1 }
  0x13   : > { %p2044_p13 = pneg %p2293_p11 }
  0x15   : > { %p2045_p0 = pnand %p2044_p13, %p2043_p12 }
  0x17   : > { %p2046_p3 = pneg %p2045_p0 }
  0x19   : > { %p2051_p7 = pnand %p2049_p5, %p2046_p3 }
  0x1b   : > { %2054 = shalt.err (!%p2051_p7)
}
  0x1c   : > { %s2055_s14 = scalar_lea.vmem %s2286_s28, 16384  ;;  %p2063_p2 = scmp.lt.s32.totalorder %s2286_s28, %s2286_s28 }
  0x1d   : > { %p2056_p9 = scmp.ne.s32.totalorder %s2286_s28, %s2055_s14  ;;  %p2064_p12 = scmp.lt.s32.totalorder %s2055_s14, %s2055_s14 }
  0x1f   : > { %p2058_p10 = pnand %p2056_p9, %p2044_p13  ;;  %p2065_p0 = por %p2064_p12, %p2063_p2 }
  0x21   : > { %p2059_p1 = pneg %p2058_p10 }
  0x23   : > { %p2066_p6 = pnand %p2065_p0, %p2059_p1 }
  0x25   : > { %2069 = shalt.err (!%p2066_p6)
}
  0x26   : > { %s2202_s15 = smov 128   ;;  %s2203_s16 = smov 8  }
  0x27   : > { %1774 = dma.hbm_to_vmem [thread:$0]  (!%p2293_p11), %s2505_s1, 16384, %s2286_s28, [#allocation6], %s2202_s15, %s2202_s15, %s2203_s16  }
  0x28   : > { %s2070_s7 = scalar_lea.hbm %s2507_s3, 2048 }
  0x29   : > { %p2071_p2 = scmp.ne.s32.totalorder %s2507_s3, %s2070_s7  ;;  %p2077_p10 = scmp.lt.u32.totalorder %s2070_s7, %s2507_s3 }
  0x2b   : > { %p2073_p1 = pnand %p2071_p2, %p2044_p13 }
  0x2d   : > { %p2074_p6 = pneg %p2073_p1 }
  0x2f   : > { %p2079_p3 = pnand %p2077_p10, %p2074_p6 }
  0x31   : > { %2082 = shalt.err (!%p2079_p3)
}
  0x32   : > { %s2083_s28 = scalar_lea.vmem %s2297_s6, 2048  ;;  %p2091_p12 = scmp.lt.s32.totalorder %s2297_s6, %s2297_s6 }
  0x33   : > { %p2084_p5 = scmp.ne.s32.totalorder %s2297_s6, %s2083_s28  ;;  %p2092_p0 = scmp.lt.s32.totalorder %s2083_s28, %s2083_s28 }
  0x35   : > { %p2086_p7 = pnand %p2084_p5, %p2044_p13  ;;  %p2093_p2 = por %p2092_p0, %p2091_p12 }
  0x37   : > { %p2087_p9 = pneg %p2086_p7 }
  0x39   : > { %p2094_p1 = pnand %p2093_p2, %p2087_p9 }
  0x3b   : > { %2097 = shalt.err (!%p2094_p1)
}
  0x3c   : > { %s2204_s12 = smov 64   ;;  %s2205_s13 = smov 4  }
  0x3d   : > { %1777 = dma.hbm_to_vmem [thread:$0]  (!%p2293_p11), %s2507_s3, 2048, %s2297_s6, [#allocation6], %s2204_s12, %s2204_s12, %s2205_s13  }
  0x3e   : > { %s2354_s16 = sadd.s32 1, %s2198_s21   ;;  %s29_s23 = sadd.s32 1, %s2194_s20 }
  0x3f   : > { %s26_s17 = ssub.s32 %s2198_s21, %s2354_s16  ;;  %p36_p6 = scmp.ne.s32.totalorder %s2194_s20, %s2190_s19 }
  0x40   : > { %p27_p13 = scmp.eq.s32.totalorder %s26_s17, 0  ;;  %p37_p10 = scmp.eq.s32.totalorder %s2198_s21, 0 }
  0x41   : > { %p2517_p5 = scmp.eq.s32.totalorder %s2263_s22, 1  ;;  %p1788_p9 = scmp.lt.s32.totalorder %s2198_s21, 2 }
  0x42   : > { %s2363_s27 = scalar_select %p27_p13, %s2194_s20, %s29_s23  }
  0x43   : > { %p38_p3 = por %p37_p10, %p36_p6  ;;  %p2367_p7 = por %p2517_p5, %p36_p6 }
  0x44   : > { %s208_s30 = sand.u32 1, %s2194_s20   ;;  %s1723_s6 = sshll.u32 %s2198_s21, 11 }
  0x45   : > { %s2518_s29 = scalar_select %p2367_p7, 1, 0 }
  0x46   : > { %s1563_s7 = sshll.u32 %s208_s30, 7  ;;  %s2377_s10 = scalar_lea.hbm %s2504_s0, %s1723_s6 }
  0x47   : > { %s212_s11 = scalar_lea.vmem [#allocation2], %s1563_s7  ;;  %p2381_p11 = pnand %p1788_p9, %p38_p3 }
  0x48   : > { %s220_s28 = sshll.u32 %s212_s11, 4  ;;  %s2385_s14 = scalar_lea.sflag [#allocation3], %s208_s30  ;;  %s2379_s28 = int_to_ptr.vmem [resolvable:$true] %s220_s28 }
  0x49   : > { %s2098_s15 = scalar_lea.hbm %s2377_s10, 2048  ;;  %p2100_p0 = pneg %p2381_p11 }
  0x4a   : > { %p2099_p12 = scmp.ne.s32.totalorder %s2377_s10, %s2098_s15  ;;  %s2103_s7 = scalar_lea.hbm %s2504_s0, 4096 }
  0x4b   : > { %p2104_p13 = scmp.lt.u32.totalorder %s2377_s10, %s2504_s0  ;;  %p2105_p6 = scmp.lt.u32.totalorder %s2103_s7, %s2098_s15 }
  0x4c   : > { %p2101_p2 = pnand %p2100_p0, %p2099_p12  ;;  %p2107_p3 = scmp.lt.u32.totalorder %s2098_s15, %s2377_s10 }
  0x4d   : > { %p2106_p10 = por %p2105_p6, %p2104_p13 }
  0x4e   : > { %p2102_p1 = pneg %p2101_p2 }
  0x4f   : > { %p2108_p5 = por %p2107_p3, %p2106_p10 }
  0x51   : > { %p2109_p9 = pnand %p2108_p5, %p2102_p1 }
  0x53   : > { %2112 = shalt.err (!%p2109_p9)
}
  0x54   : > { %s2113_s30 = scalar_lea.vmem %s2379_s28, 2048  ;;  %s2206_s9 = smov [#allocation2]  }
  0x55   : > { %p2114_p12 = scmp.ne.s32.totalorder %s2379_s28, %s2113_s30  ;;  %s2118_s11 = sshll.u32 %s2206_s9, 4  ;;  %s2119_s11 = int_to_ptr.vmem [resolvable:$false] %s2118_s11 }
  0x56   : > { %s2120_s17 = scalar_lea.vmem %s2119_s11, 4096  ;;  %p2121_p4 = scmp.lt.s32.totalorder %s2379_s28, %s2119_s11 }
  0x57   : > { %p2116_p2 = pnand %p2114_p12, %p2100_p0  ;;  %p2122_p13 = scmp.lt.s32.totalorder %s2120_s17, %s2113_s30 }
  0x59   : > { %p2117_p7 = pneg %p2116_p2  ;;  %p2123_p6 = por %p2122_p13, %p2121_p4 }
  0x5b   : > { %p2124_p10 = pnand %p2123_p6, %p2117_p7 }
  0x5d   : > { %2127 = shalt.err (!%p2124_p10)
}
  0x5e   : > { %s2207_s15 = smov 1024   ;;  %232 = sbr.rel (%p2282_p8) target bundleno = 693 (0x2b5), region = 40 }
  0x5f   : > { %1781 = dma.hbm_to_vmem [thread:$0]  (!%p2381_p11), %s2377_s10, 2048, %s2379_s28, %s2385_s14, %s2207_s15, %s2207_s15, %s2204_s12  }
  0x60   : > { %s2417_s23 = sand.u32 (!%p2282_p8), 1, %s2190_s19   ;;  %p2520_p4 = scmp.ne.s32.totalorder (!%p2282_p8), %s2513_s24, 0 }
  0x61   : > { %s1568_s7 = sshll.u32 (!%p2282_p8), %s2417_s23, 7  ;;  %s235_s6 = scalar_lea.sflag (!%p2282_p8), [#allocation3], %s2417_s23 }
  0x62   : > { %s2421_s8 = scalar_lea.vmem (!%p2282_p8), [#allocation2], %s1568_s7 }
  0x65   : > { %2173 = dma.done.wait (%p2520_p4), %s235_s6, 2048  }
  0x66   : > { %2175 = vsyncadd (%p2520_p4), %s235_s6, 4294965248  ;;  %p2521_p7 = scmp.eq.s32.totalorder %s2263_s22, 0 }
  0x68   : > { %2177 = dma.done.wait (%p2521_p7), [#allocation6], 18432   ;;  %p2522_p8 = pmov %p2521_p7 }
  0x69   : > { %v1834_v0 = vld [vmem:[#allocation5 + $0x4] ss:$8 sps:$4 sm:$0xff]   ;;  %v1838_v2 = vld [vmem:[#allocation5] ss:$8 sps:$4 sm:$0xff]   ;;  %v1840_v4 = vld [vmem:[#allocation5 + $0x14] ss:$8 sps:$4 sm:$0xff]  }
  0x6a   : > { %2179 = vsyncadd (%p2522_p8), [#allocation6], 4294948864  ;;  %v1836_v1 = vld [vmem:[#allocation5 + $0x204] ss:$8 sps:$4 sm:$0xff]   ;;  %1068 = vmatprep.subr.bf16.mxu1 %v1834_v0  ;;  %v1839_v3 = vld [vmem:[#allocation5 + $0x200] ss:$8 sps:$4 sm:$0xff]  }
  0x6b   : > { %1154 = vmatprep.subr.bf16.mxu0 %v1836_v1  ;;  %1069 = vmatpush1.bf16.msra.mxu1 %v1838_v2  ;;  %v1842_v5 = vld [vmem:[#allocation5 + $0x214] ss:$8 sps:$4 sm:$0xff]   ;;  %v1844_v6 = vld [vmem:[#allocation5 + $0x10] ss:$8 sps:$4 sm:$0xff]   ;;  %v1846_v8 = vld [vmem:[#allocation5 + $0x24] ss:$8 sps:$4 sm:$0xff]  }
  0x6c   : > { %1155 = vmatpush1.bf16.msra.mxu0 %v1839_v3  ;;  %1070 = vmatprep.subr.bf16.mxu1 %v1840_v4  ;;  %v1845_v7 = vld [vmem:[#allocation5 + $0x210] ss:$8 sps:$4 sm:$0xff]   ;;  %v1848_v9 = vld [vmem:[#allocation5 + $0x224] ss:$8 sps:$4 sm:$0xff]   ;;  %v1850_v10 = vld [vmem:[#allocation5 + $0x20] ss:$8 sps:$4 sm:$0xff]  }
  0x6d   : > { %1156 = vmatprep.subr.bf16.mxu0 %v1842_v5  ;;  %v1851_v11 = vld [vmem:[#allocation5 + $0x220] ss:$8 sps:$4 sm:$0xff]   ;;  %v1852_v12 = vld [vmem:[#allocation5 + $0x34] ss:$8 sps:$4 sm:$0xff]   ;;  %v1856_v14 = vld [vmem:[#allocation5 + $0x30] ss:$8 sps:$4 sm:$0xff]  }
  0x6e   : > { %v1854_v13 = vld [vmem:[#allocation5 + $0x234] ss:$8 sps:$4 sm:$0xff]   ;;  %v1857_v15 = vld [vmem:[#allocation5 + $0x230] ss:$8 sps:$4 sm:$0xff]   ;;  %v1858_v16 = vld [vmem:[#allocation5 + $0x44] ss:$8 sps:$4 sm:$0xff]  }
  0x6f   : > { %1071 = vmatpush1.bf16.msra.mxu1 %v1844_v6  ;;  %v1860_v17 = vld [vmem:[#allocation5 + $0x244] ss:$8 sps:$4 sm:$0xff]   ;;  %v1862_v18 = vld [vmem:[#allocation5 + $0x40] ss:$8 sps:$4 sm:$0xff]   ;;  %v1864_v20 = vld [vmem:[#allocation5 + $0x54] ss:$8 sps:$4 sm:$0xff]  }
  0x70   : > { %1157 = vmatpush1.bf16.msra.mxu0 %v1845_v7  ;;  %1072 = vmatprep.subr.bf16.mxu1 %v1846_v8  ;;  %v1863_v19 = vld [vmem:[#allocation5 + $0x240] ss:$8 sps:$4 sm:$0xff]   ;;  %v1866_v21 = vld [vmem:[#allocation5 + $0x254] ss:$8 sps:$4 sm:$0xff]   ;;  %v1868_v22 = vld [vmem:[#allocation5 + $0x50] ss:$8 sps:$4 sm:$0xff]  }
  0x71   : > { %1158 = vmatprep.subr.bf16.mxu0 %v1848_v9  ;;  %v1869_v23 = vld [vmem:[#allocation5 + $0x250] ss:$8 sps:$4 sm:$0xff]   ;;  %v1870_v24 = vld [vmem:[#allocation5 + $0x64] ss:$8 sps:$4 sm:$0xff]   ;;  %v1874_v26 = vld [vmem:[#allocation5 + $0x60] ss:$8 sps:$4 sm:$0xff]  }
  0x72   : > { %v1872_v25 = vld [vmem:[#allocation5 + $0x264] ss:$8 sps:$4 sm:$0xff]   ;;  %v1875_v27 = vld [vmem:[#allocation5 + $0x260] ss:$8 sps:$4 sm:$0xff]   ;;  %v1876_v28 = vld [vmem:[#allocation5 + $0x74] ss:$8 sps:$4 sm:$0xff]  }
  0x73   : > { %1073 = vmatpush1.bf16.msra.mxu1 %v1850_v10  ;;  %v1878_v29 = vld [vmem:[#allocation5 + $0x274] ss:$8 sps:$4 sm:$0xff]   ;;  %v1880_v30 = vld [vmem:[#allocation5 + $0x70] ss:$8 sps:$4 sm:$0xff]   ;;  %v1882_v32 = vld [vmem:[#allocation5 + $0x84] ss:$8 sps:$4 sm:$0xff]  }
  0x74   : > { %1159 = vmatpush1.bf16.msra.mxu0 %v1851_v11  ;;  %1074 = vmatprep.subr.bf16.mxu1 %v1852_v12  ;;  %v1881_v31 = vld [vmem:[#allocation5 + $0x270] ss:$8 sps:$4 sm:$0xff]   ;;  %v1884_v33 = vld [vmem:[#allocation5 + $0x284] ss:$8 sps:$4 sm:$0xff]   ;;  %v1886_v34 = vld [vmem:[#allocation5 + $0x80] ss:$8 sps:$4 sm:$0xff]  }
  0x75   : > { %1160 = vmatprep.subr.bf16.mxu0 %v1854_v13  ;;  %v1887_v35 = vld [vmem:[#allocation5 + $0x280] ss:$8 sps:$4 sm:$0xff]   ;;  %v1888_v36 = vld [vmem:[#allocation5 + $0x94] ss:$8 sps:$4 sm:$0xff]   ;;  %v1892_v38 = vld [vmem:[#allocation5 + $0x90] ss:$8 sps:$4 sm:$0xff]  }
  0x76   : > { %v1890_v37 = vld [vmem:[#allocation5 + $0x294] ss:$8 sps:$4 sm:$0xff]   ;;  %v1893_v39 = vld [vmem:[#allocation5 + $0x290] ss:$8 sps:$4 sm:$0xff]   ;;  %v1894_v40 = vld [vmem:[#allocation5 + $0xa4] ss:$8 sps:$4 sm:$0xff]  }
  0x77   : > { %1075 = vmatpush1.bf16.msra.mxu1 %v1856_v14  ;;  %v1896_v41 = vld [vmem:[#allocation5 + $0x2a4] ss:$8 sps:$4 sm:$0xff]   ;;  %v1898_v42 = vld [vmem:[#allocation5 + $0xa0] ss:$8 sps:$4 sm:$0xff]   ;;  %v1900_v44 = vld [vmem:[#allocation5 + $0xb4] ss:$8 sps:$4 sm:$0xff]  }
  0x78   : > { %1161 = vmatpush1.bf16.msra.mxu0 %v1857_v15  ;;  %1076 = vmatprep.subr.bf16.mxu1 %v1858_v16  ;;  %v1899_v43 = vld [vmem:[#allocation5 + $0x2a0] ss:$8 sps:$4 sm:$0xff]   ;;  %v1902_v45 = vld [vmem:[#allocation5 + $0x2b4] ss:$8 sps:$4 sm:$0xff]   ;;  %v1904_v46 = vld [vmem:[#allocation5 + $0xb0] ss:$8 sps:$4 sm:$0xff]  }
  0x79   : > { %1162 = vmatprep.subr.bf16.mxu0 %v1860_v17  ;;  %v1905_v47 = vld [vmem:[#allocation5 + $0x2b0] ss:$8 sps:$4 sm:$0xff]   ;;  %v277_v48 = vld [vmem:[%s2421_s8 + $0x8] sm:$0xff]  ;;  %v1912_v58 = vld [vmem:[#allocation5 + $0xd4] ss:$8 sps:$4 sm:$0xff]   ;;  %s1571_s12 = sshll.u32 %s2417_s23, 4 }
  0x7a   : > { %v285_v49 = vld [vmem:[%s2421_s8 + $0x48] sm:$0xff]  ;;  %v1914_v59 = vld [vmem:[#allocation5 + $0x2d4] ss:$8 sps:$4 sm:$0xff]   ;;  %v1916_v60 = vld [vmem:[#allocation5 + $0xd0] ss:$8 sps:$4 sm:$0xff]   ;;  %s272_s13 = scalar_lea.vmem [#allocation8], %s1571_s12 }
  0x7b   : > { %1077 = vmatpush1.bf16.msra.mxu1 %v1862_v18  ;;  %v1906_v50 = vld [vmem:[#allocation5 + $0xc4] ss:$8 sps:$4 sm:$0xff]   ;;  %v293_v52 = vpack.c.bf16 %v285_v49, %v277_v48  ;;  %v1910_v56 = vld [vmem:[#allocation5 + $0xc0] ss:$8 sps:$4 sm:$0xff]   ;;  %v1917_v61 = vld [vmem:[#allocation5 + $0x2d0] ss:$8 sps:$4 sm:$0xff]  }
  0x7c   : > { %1163 = vmatpush1.bf16.msra.mxu0 %v1863_v19  ;;  %1078 = vmatprep.subr.bf16.mxu1 %v1864_v20  ;;  %v1908_v51 = vld [vmem:[#allocation5 + $0x2c4] ss:$8 sps:$4 sm:$0xff]   ;;  %v1911_v57 = vld [vmem:[#allocation5 + $0x2c0] ss:$8 sps:$4 sm:$0xff]   ;;  %v1924_v2 = vld [vmem:[#allocation5 + $0xf4] ss:$8 sps:$4 sm:$0xff]  }
  0x7d   : > { %1164 = vmatprep.subr.bf16.mxu0 %v1866_v21  ;;  %v281_v53 = vld [vmem:[%s2421_s8 + $0x28] sm:$0xff]  ;;  %1100 = vmatprep.mubr.bf16.mxu1 %v293_v52  ;;  %v1926_v3 = vld [vmem:[#allocation5 + $0x2f4] ss:$8 sps:$4 sm:$0xff]   ;;  %v1928_v4 = vld [vmem:[#allocation5 + $0xf0] ss:$8 sps:$4 sm:$0xff]   ;;  %s1466_s14 = sshll.u32 %s272_s13, 4  ;;  %s2455_s14 = int_to_ptr.vmem [resolvable:$true] %s1466_s14 }
  0x7e   : > { %v289_v54 = vld [vmem:[%s2421_s8 + $0x68] sm:$0xff]  ;;  %v1929_v5 = vld [vmem:[#allocation5 + $0x2f0] ss:$8 sps:$4 sm:$0xff]   ;;  %v276_v6 = vld [vmem:[%s2421_s8] sm:$0xff]  ;;  %s1724_s30 = sshll.u32 %s2263_s22, 8  ;;  %s1453_s15 = scalar_lea.sflag [#allocation4], %s2417_s23 }
  0x7f   : > { %1079 = vmatpush1.bf16.msra.mxu1 %v1868_v22  ;;  %v297_v55 = vpack.c.bf16 %v289_v54, %v281_v53  ;;  %v1918_v62 = vld [vmem:[#allocation5 + $0xe4] ss:$8 sps:$4 sm:$0xff]   ;;  %v1922_v0 = vld [vmem:[#allocation5 + $0xe0] ss:$8 sps:$4 sm:$0xff]   ;;  %v1938_v16 = vld [vmem:[#allocation5 + $0x114] ss:$8 sps:$4 sm:$0xff]   ;;  %s2460_s17 = scalar_lea.hbm %s2509_s5, %s1724_s30 }
  0x80   : > { %1165 = vmatpush1.bf16.msra.mxu0 %v1869_v23  ;;  %1080 = vmatprep.subr.bf16.mxu1 %v1870_v24  ;;  %v1920_v63 = vld [vmem:[#allocation5 + $0x2e4] ss:$8 sps:$4 sm:$0xff]   ;;  %v1923_v1 = vld [vmem:[#allocation5 + $0x2e0] ss:$8 sps:$4 sm:$0xff]   ;;  %v1941_v17 = vld [vmem:[#allocation5 + $0x314] ss:$8 sps:$4 sm:$0xff]  }
  0x81   : > { %1166 = vmatprep.subr.bf16.mxu0 %v1872_v25  ;;  %1186 = vmatprep.mubr.bf16.mxu0 %v297_v55  ;;  %v1932_v7 = vld [vmem:[#allocation5 + $0x104] ss:$8 sps:$4 sm:$0xff]   ;;  %v1930_v12 = vld [vmem:[#allocation5 + $0x100] ss:$8 sps:$4 sm:$0xff]   ;;  %v1936_v18 = vld [vmem:[#allocation5 + $0x110] ss:$8 sps:$4 sm:$0xff]  }
  0x82   : > { %v284_v8 = vld [vmem:[%s2421_s8 + $0x40] sm:$0xff]  ;;  %v1939_v19 = vld [vmem:[#allocation5 + $0x310] ss:$8 sps:$4 sm:$0xff]   ;;  %v1950_v24 = vld [vmem:[#allocation5 + $0x134] ss:$8 sps:$4 sm:$0xff]   ;;  %s2128_s7 = scalar_lea.vmem %s2455_s14, 256 }
  0x83   : > { %1081 = vmatpush1.bf16.msra.mxu1 %v1874_v26  ;;  %v280_v9 = vld [vmem:[%s2421_s8 + $0x20] sm:$0xff]  ;;  %v292_v14 = vpack.c.bf16 %v284_v8, %v276_v6  ;;  %v1953_v25 = vld [vmem:[#allocation5 + $0x334] ss:$8 sps:$4 sm:$0xff]   ;;  %v1948_v26 = vld [vmem:[#allocation5 + $0x130] ss:$8 sps:$4 sm:$0xff]   ;;  %p2129_p11 = scmp.ne.s32.totalorder %s2455_s14, %s2128_s7  ;;  %p2523_p0 = scmp.ne.s32.totalorder %s2518_s29, 0 }
  0x84   : > { %1167 = vmatpush1.bf16.msra.mxu0 %v1875_v27  ;;  %1082 = vmatprep.subr.bf16.mxu1 %v1876_v28  ;;  %v288_v10 = vld [vmem:[%s2421_s8 + $0x60] sm:$0xff]  ;;  %v1951_v27 = vld [vmem:[#allocation5 + $0x330] ss:$8 sps:$4 sm:$0xff]   ;;  %v1986_v54 = vld [vmem:[#allocation5 + $0x194] ss:$8 sps:$4 sm:$0xff]   ;;  %s2209_s22 = smov [#allocation8]  }
  0x85   : > { %1168 = vmatprep.subr.bf16.mxu0 %v1878_v29  ;;  %v1935_v11 = vld [vmem:[#allocation5 + $0x304] ss:$8 sps:$4 sm:$0xff]   ;;  %v1933_v13 = vld [vmem:[#allocation5 + $0x300] ss:$8 sps:$4 sm:$0xff]   ;;  %v296_v15 = vpack.c.bf16 %v288_v10, %v280_v9  ;;  %v1975_v49 = vld [vmem:[#allocation5 + $0x370] ss:$8 sps:$4 sm:$0xff]   ;;  %p2130_p1 = pnand %p2129_p11, %p2523_p0 }
  0x86   : > { %v1944_v20 = vld [vmem:[#allocation5 + $0x124] ss:$8 sps:$4 sm:$0xff]   ;;  %v1942_v22 = vld [vmem:[#allocation5 + $0x120] ss:$8 sps:$4 sm:$0xff]   ;;  %v1989_v55 = vld [vmem:[#allocation5 + $0x394] ss:$8 sps:$4 sm:$0xff]  }
  0x87   : > { %1083 = vmatpush1.bf16.msra.mxu1 %v1880_v30  ;;  %v1947_v21 = vld [vmem:[#allocation5 + $0x324] ss:$8 sps:$4 sm:$0xff]   ;;  %v1945_v23 = vld [vmem:[#allocation5 + $0x320] ss:$8 sps:$4 sm:$0xff]   ;;  %v2010_v6 = vld [vmem:[#allocation5 + $0x1d4] ss:$8 sps:$4 sm:$0xff]   ;;  %p2131_p3 = pneg %p2130_p1 }
  0x88   : > { %1169 = vmatpush1.bf16.msra.mxu0 %v1881_v31  ;;  %1084 = vmatprep.subr.bf16.mxu1 %v1882_v32  ;;  %v1956_v28 = vld [vmem:[#allocation5 + $0x144] ss:$8 sps:$4 sm:$0xff]   ;;  %v1954_v30 = vld [vmem:[#allocation5 + $0x140] ss:$8 sps:$4 sm:$0xff]   ;;  %v1962_v32 = vld [vmem:[#allocation5 + $0x154] ss:$8 sps:$4 sm:$0xff]  }
  0x89   : > { %1170 = vmatprep.subr.bf16.mxu0 %v1884_v33  ;;  %v1959_v29 = vld [vmem:[#allocation5 + $0x344] ss:$8 sps:$4 sm:$0xff]   ;;  %v1957_v31 = vld [vmem:[#allocation5 + $0x340] ss:$8 sps:$4 sm:$0xff]   ;;  %v1965_v33 = vld [vmem:[#allocation5 + $0x354] ss:$8 sps:$4 sm:$0xff]  }
  0x8a   : > { %v1978_v52 = vld [vmem:[#allocation5 + $0x180] ss:$8 sps:$4 sm:$0xff]   ;;  %v2008_v8 = vld [vmem:[#allocation5 + $0x1d0] ss:$8 sps:$4 sm:$0xff]   ;;  %v2016_v10 = vld [vmem:[#allocation5 + $0x1e4] ss:$8 sps:$4 sm:$0xff]  }
  0x8b   : > { %1085 = vmatpush1.bf16.msra.mxu1 %v1886_v34  ;;  %v1960_v34 = vld [vmem:[#allocation5 + $0x150] ss:$8 sps:$4 sm:$0xff]   ;;  %v1981_v53 = vld [vmem:[#allocation5 + $0x380] ss:$8 sps:$4 sm:$0xff]   ;;  %s2132_s6 = sshll.u32 %s2209_s22, 4  ;;  %s2133_s6 = int_to_ptr.vmem [resolvable:$false] %s2132_s6 }
  0x8c   : > { %1171 = vmatpush1.bf16.msra.mxu0 %v1887_v35  ;;  %1086 = vmatprep.subr.bf16.mxu1 %v1888_v36  ;;  %v1963_v35 = vld [vmem:[#allocation5 + $0x350] ss:$8 sps:$4 sm:$0xff]   ;;  %v1968_v36 = vld [vmem:[#allocation5 + $0x164] ss:$8 sps:$4 sm:$0xff]   ;;  %p2135_p5 = scmp.lt.s32.totalorder %s2455_s14, %s2133_s6 }
  0x8d   : > { %1172 = vmatprep.subr.bf16.mxu0 %v1890_v37  ;;  %v1971_v37 = vld [vmem:[#allocation5 + $0x364] ss:$8 sps:$4 sm:$0xff]   ;;  %v2011_v9 = vld [vmem:[#allocation5 + $0x3d0] ss:$8 sps:$4 sm:$0xff]  }
  0x8f   : > { %1087 = vmatpush1.bf16.msra.mxu1 %v1892_v38  ;;  %v1966_v38 = vld [vmem:[#allocation5 + $0x160] ss:$8 sps:$4 sm:$0xff]  }
  0x90   : > { %1173 = vmatpush1.bf16.msra.mxu0 %v1893_v39  ;;  %1088 = vmatprep.subr.bf16.mxu1 %v1894_v40  ;;  %v1969_v39 = vld [vmem:[#allocation5 + $0x360] ss:$8 sps:$4 sm:$0xff]   ;;  %v279_v40 = vld [vmem:[%s2421_s8 + $0x18] sm:$0xff] }
  0x91   : > { %1174 = vmatprep.subr.bf16.mxu0 %v1896_v41  ;;  %v287_v41 = vld [vmem:[%s2421_s8 + $0x58] sm:$0xff] }
  0x93   : > { %1089 = vmatpush1.bf16.msra.mxu1 %v1898_v42  ;;  %v283_v42 = vld [vmem:[%s2421_s8 + $0x38] sm:$0xff] }
  0x94   : > { %1175 = vmatpush1.bf16.msra.mxu0 %v1899_v43  ;;  %1090 = vmatprep.subr.bf16.mxu1 %v1900_v44  ;;  %v1974_v43 = vld [vmem:[#allocation5 + $0x174] ss:$8 sps:$4 sm:$0xff]  }
  0x95   : > { %1176 = vmatprep.subr.bf16.mxu0 %v1902_v45  ;;  %v1977_v44 = vld [vmem:[#allocation5 + $0x374] ss:$8 sps:$4 sm:$0xff]   ;;  %v295_v45 = vpack.c.bf16 %v287_v41, %v279_v40  ;;  %v1244_v40 = vlaneseq }
  0x97   : > { %1091 = vmatpush1.bf16.msra.mxu1 %v1904_v46  ;;  %v291_v46 = vld [vmem:[%s2421_s8 + $0x78] sm:$0xff]  ;;  %v1245_v41 = vshrl.u32 %v1244_v40, 7 }
  0x98   : > { %1177 = vmatpush1.bf16.msra.mxu0 %v1905_v47  ;;  %1092 = vmatprep.subr.bf16.mxu1 %v1906_v50  ;;  %v1972_v47 = vld [vmem:[#allocation5 + $0x170] ss:$8 sps:$4 sm:$0xff]   ;;  %v299_v48 = vpack.c.bf16 %v291_v46, %v283_v42  ;;  %v1980_v50 = vld [vmem:[#allocation5 + $0x184] ss:$8 sps:$4 sm:$0xff]  }
  0x99   : > { %1178 = vmatprep.subr.bf16.mxu0 %v1908_v51  ;;  %v1983_v51 = vld [vmem:[#allocation5 + $0x384] ss:$8 sps:$4 sm:$0xff]   ;;  %v1246_v42 = vsub.s32 0, %v1245_v41 }
  0x9b   : > { %1093 = vmatpush1.bf16.msra.mxu1 %v1910_v56  ;;  %v1984_v56 = vld [vmem:[#allocation5 + $0x190] ss:$8 sps:$4 sm:$0xff]  }
  0x9c   : > { %1179 = vmatpush1.bf16.msra.mxu0 %v1911_v57  ;;  %1094 = vmatprep.subr.bf16.mxu1 %v1912_v58  ;;  %v1987_v57 = vld [vmem:[#allocation5 + $0x390] ss:$8 sps:$4 sm:$0xff]   ;;  %v1992_v58 = vld [vmem:[#allocation5 + $0x1a4] ss:$8 sps:$4 sm:$0xff]  }
  0x9d   : > { %1180 = vmatprep.subr.bf16.mxu0 %v1914_v59  ;;  %v1995_v59 = vld [vmem:[#allocation5 + $0x3a4] ss:$8 sps:$4 sm:$0xff]  }
  0x9f   : > { %1095 = vmatpush1.bf16.msra.mxu1 %v1916_v60  ;;  %v1990_v60 = vld [vmem:[#allocation5 + $0x1a0] ss:$8 sps:$4 sm:$0xff]  }
  0xa0   : > { %1181 = vmatpush1.bf16.msra.mxu0 %v1917_v61  ;;  %1096 = vmatprep.subr.bf16.mxu1 %v1918_v62  ;;  %v1993_v61 = vld [vmem:[#allocation5 + $0x3a0] ss:$8 sps:$4 sm:$0xff]   ;;  %v1998_v62 = vld [vmem:[#allocation5 + $0x1b4] ss:$8 sps:$4 sm:$0xff]  }
  0xa1   : > { %1182 = vmatprep.subr.bf16.mxu0 %v1920_v63  ;;  %v2001_v63 = vld [vmem:[#allocation5 + $0x3b4] ss:$8 sps:$4 sm:$0xff]  }
  0xa3   : > { %1097 = vmatpush1.bf16.msra.mxu1 %v1922_v0  ;;  %v1996_v0 = vld [vmem:[#allocation5 + $0x1b0] ss:$8 sps:$4 sm:$0xff]  }
  0xa4   : > { %1183 = vmatpush1.bf16.msra.mxu0 %v1923_v1  ;;  %1098 = vmatprep.subr.bf16.mxu1 %v1924_v2  ;;  %v1999_v1 = vld [vmem:[#allocation5 + $0x3b0] ss:$8 sps:$4 sm:$0xff]   ;;  %v2004_v2 = vld [vmem:[#allocation5 + $0x1c4] ss:$8 sps:$4 sm:$0xff]  }
  0xa5   : > { %1184 = vmatprep.subr.bf16.mxu0 %v1926_v3  ;;  %v2007_v3 = vld [vmem:[#allocation5 + $0x3c4] ss:$8 sps:$4 sm:$0xff]  }
  0xa7   : > { %1099 = vmatpush1.bf16.msra.mxu1 %v1928_v4  ;;  %v2002_v4 = vld [vmem:[#allocation5 + $0x1c0] ss:$8 sps:$4 sm:$0xff]  }
  0xa8   : > { %1185 = vmatpush1.bf16.msra.mxu0 %v1929_v5  ;;  %1111 = vmatprep.subr.bf16.mxu1 %v1932_v7  ;;  %v2005_v5 = vld [vmem:[#allocation5 + $0x3c0] ss:$8 sps:$4 sm:$0xff]   ;;  %v2013_v7 = vld [vmem:[#allocation5 + $0x3d4] ss:$8 sps:$4 sm:$0xff]  }
  0xa9   : > { %1197 = vmatprep.subr.bf16.mxu0 %v1935_v11  ;;  %v2019_v11 = vld [vmem:[#allocation5 + $0x3e4] ss:$8 sps:$4 sm:$0xff]  }
  0xaa   : > { %1101 = vmatmul.mubr.bf16.vlgmr.msra.gmra.mrb[0].mxu1 %v292_v14  ;;  %v2022_v14 = vld [vmem:[#allocation5 + $0x1f4] ss:$8 sps:$4 sm:$0xff]  }
  0xab   : > { %1187 = vmatmul.mubr.bf16.vlgmr.msra.gmra.mrb[0].mxu0 %v296_v15  ;;  %1112 = vmatpush1.bf16.msra.mxu1 %v1930_v12  ;;  %v2014_v12 = vld [vmem:[#allocation5 + $0x1e0] ss:$8 sps:$4 sm:$0xff]   ;;  %v2025_v15 = vld [vmem:[#allocation5 + $0x3f4] ss:$8 sps:$4 sm:$0xff]  }
  0xac   : > { %1198 = vmatpush1.bf16.msra.mxu0 %v1933_v13  ;;  %1113 = vmatprep.subr.bf16.mxu1 %v1938_v16  ;;  %v2017_v13 = vld [vmem:[#allocation5 + $0x3e0] ss:$8 sps:$4 sm:$0xff]   ;;  %v2020_v16 = vld [vmem:[#allocation5 + $0x1f0] ss:$8 sps:$4 sm:$0xff]  }
  0xad   : > { %1199 = vmatprep.subr.bf16.mxu0 %v1941_v17  ;;  %1143 = vmatprep.mubr.bf16.mxu1 %v295_v45  ;;  %v2023_v17 = vld [vmem:[#allocation5 + $0x3f0] ss:$8 sps:$4 sm:$0xff]  }
  0xae   : > { %1229 = vmatprep.mubr.bf16.mxu0 %v299_v48 }
  0xaf   : > { %1114 = vmatpush1.bf16.msra.mxu1 %v1936_v18  ;;  %v278_v18 = vld [vmem:[%s2421_s8 + $0x10] sm:$0xff] }
  0xb0   : > { %1200 = vmatpush1.bf16.msra.mxu0 %v1939_v19  ;;  %1115 = vmatprep.subr.bf16.mxu1 %v1944_v20  ;;  %v286_v19 = vld [vmem:[%s2421_s8 + $0x50] sm:$0xff] }
  0xb1   : > { %1201 = vmatprep.subr.bf16.mxu0 %v1947_v21  ;;  %v282_v20 = vld [vmem:[%s2421_s8 + $0x30] sm:$0xff] }
  0xb2   : > { %v290_v21 = vld [vmem:[%s2421_s8 + $0x70] sm:$0xff]  ;;  %s2134_s8 = scalar_lea.vmem %s2133_s6, 512 }
  0xb3   : > { %1116 = vmatpush1.bf16.msra.mxu1 %v1942_v22  ;;  %v2026_v22 = vld [vmem:[#allocation7 + $0x40] sm:$0xff]   ;;  %p2136_p9 = scmp.lt.s32.totalorder %s2134_s8, %s2128_s7 }
  0xb4   : > { %1202 = vmatpush1.bf16.msra.mxu0 %v1945_v23  ;;  %1117 = vmatprep.subr.bf16.mxu1 %v1950_v24  ;;  %v294_v23 = vpack.c.bf16 %v286_v19, %v278_v18  ;;  %v298_v24 = vpack.c.bf16 %v290_v21, %v282_v20 }
  0xb5   : > { %1203 = vmatprep.subr.bf16.mxu0 %v1953_v25  ;;  %v2027_v25 = vld [vmem:[#allocation7] sm:$0xff]   ;;  %p2137_p12 = por %p2136_p9, %p2135_p5 }
  0xb7   : > { %1118 = vmatpush1.bf16.msra.mxu1 %v1948_v26  ;;  %v2028_v26 = vld [vmem:[#allocation7 + $0x48] sm:$0xff]   ;;  %p2138_p2 = pnand %p2137_p12, %p2131_p3 }
  0xb8   : > { %1204 = vmatpush1.bf16.msra.mxu0 %v1951_v27  ;;  %1119 = vmatprep.subr.bf16.mxu1 %v1956_v28  ;;  %v2029_v27 = vld [vmem:[#allocation7 + $0x8] sm:$0xff]   ;;  %v2030_v28 = vld [vmem:[#allocation7 + $0x50] sm:$0xff]  }
  0xb9   : > { %1205 = vmatprep.subr.bf16.mxu0 %v1959_v29  ;;  %v2031_v29 = vld [vmem:[#allocation7 + $0x10] sm:$0xff]  }
  0xbb   : > { %1120 = vmatpush1.bf16.msra.mxu1 %v1954_v30  ;;  %v2032_v30 = vld [vmem:[#allocation7 + $0x58] sm:$0xff]  }
  0xbc   : > { %1206 = vmatpush1.bf16.msra.mxu0 %v1957_v31  ;;  %1121 = vmatprep.subr.bf16.mxu1 %v1962_v32  ;;  %v2033_v31 = vld [vmem:[#allocation7 + $0x18] sm:$0xff]   ;;  %v2034_v32 = vld [vmem:[#allocation7 + $0x60] sm:$0xff]  }
  0xbd   : > { %1207 = vmatprep.subr.bf16.mxu0 %v1965_v33  ;;  %v2035_v33 = vld [vmem:[#allocation7 + $0x20] sm:$0xff]  }
  0xbf   : > { %1122 = vmatpush1.bf16.msra.mxu1 %v1960_v34  ;;  %v2036_v34 = vld [vmem:[#allocation7 + $0x68] sm:$0xff]  }
  0xc0   : > { %1208 = vmatpush1.bf16.msra.mxu0 %v1963_v35  ;;  %1123 = vmatprep.subr.bf16.mxu1 %v1968_v36  ;;  %v2037_v35 = vld [vmem:[#allocation7 + $0x28] sm:$0xff]   ;;  %v2038_v36 = vld [vmem:[#allocation7 + $0x70] sm:$0xff]  }
  0xc1   : > { %1209 = vmatprep.subr.bf16.mxu0 %v1971_v37  ;;  %v2039_v37 = vld [vmem:[#allocation7 + $0x30] sm:$0xff]  }
  0xc3   : > { %1124 = vmatpush1.bf16.msra.mxu1 %v1966_v38  ;;  %v2040_v38 = vld [vmem:[#allocation7 + $0x78] sm:$0xff]  }
  0xc4   : > { %1210 = vmatpush1.bf16.msra.mxu0 %v1969_v39  ;;  %1125 = vmatprep.subr.bf16.mxu1 %v1974_v43  ;;  %v2041_v39 = vld [vmem:[#allocation7 + $0x38] sm:$0xff]   ;;  %v1242_v43 = vld [vmem:[%s2506_s2] sm:$0x3] }
  0xc5   : > { %1211 = vmatprep.subr.bf16.mxu0 %v1977_v44  ;;  %v1250_v44 = vsub.s32 1, %v1245_v41  ;;  %v1247_v45 = vrot.slane %v1242_v43, %v1246_v42 }
  0xc7   : > { %1126 = vmatpush1.bf16.msra.mxu1 %v1972_v47  ;;  %v1251_v46 = vrot.slane %v1242_v43, %v1250_v44  ;;  %v1254_v47 = vpack.c.bf16 %v1247_v45, %v1247_v45 }
  0xc8   : > { %1212 = vmatpush1.bf16.msra.mxu0 %v1975_v49  ;;  %1127 = vmatprep.subr.bf16.mxu1 %v1980_v50 }
  0xc9   : > { %1213 = vmatprep.subr.bf16.mxu0 %v1983_v51  ;;  %v1255_v48 = vpack.c.bf16 %v1251_v46, %v1251_v46  ;;  %v1257_v49 = vpack.i.b16 %v1254_v47, %v1254_v47 }
  0xcb   : > { %1128 = vmatpush1.bf16.msra.mxu1 %v1978_v52  ;;  %v1264_v52 = vpack.i.b16 %v1255_v48, %v1255_v48 }
  0xcc   : > { %1214 = vmatpush1.bf16.msra.mxu0 %v1981_v53  ;;  %1129 = vmatprep.subr.bf16.mxu1 %v1986_v54 }
  0xcd   : > { %1215 = vmatprep.subr.bf16.mxu0 %v1989_v55 }
  0xcf   : > { %1130 = vmatpush1.bf16.msra.mxu1 %v1984_v56 }
  0xd0   : > { %1216 = vmatpush1.bf16.msra.mxu0 %v1987_v57  ;;  %1131 = vmatprep.subr.bf16.mxu1 %v1992_v58 }
  0xd1   : > { %1217 = vmatprep.subr.bf16.mxu0 %v1995_v59 }
  0xd3   : > { %1132 = vmatpush1.bf16.msra.mxu1 %v1990_v60  ;;  %v1262_v60 = vrot.slane %v1257_v49, %v1246_v42 }
  0xd4   : > { %1218 = vmatpush1.bf16.msra.mxu0 %v1993_v61  ;;  %1133 = vmatprep.subr.bf16.mxu1 %v1998_v62 }
  0xd5   : > { %1219 = vmatprep.subr.bf16.mxu0 %v2001_v63 }
  0xd7   : > { %1134 = vmatpush1.bf16.msra.mxu1 %v1996_v0  ;;  %v1269_v0 = vrot.slane %v1264_v52, %v1246_v42 }
  0xd8   : > { %1220 = vmatpush1.bf16.msra.mxu0 %v1999_v1  ;;  %1135 = vmatprep.subr.bf16.mxu1 %v2004_v2 }
  0xd9   : > { %1221 = vmatprep.subr.bf16.mxu0 %v2007_v3 }
  0xdb   : > { %1136 = vmatpush1.bf16.msra.mxu1 %v2002_v4 }
  0xdc   : > { %1222 = vmatpush1.bf16.msra.mxu0 %v2005_v5  ;;  %1137 = vmatprep.subr.bf16.mxu1 %v2010_v6  ;;  %v2208_v5 = vmov 0  }
  0xdd   : > { %1223 = vmatprep.subr.bf16.mxu0 %v2013_v7 }
  0xdf   : > { %1138 = vmatpush1.bf16.msra.mxu1 %v2008_v8 }
  0xe0   : > { %1224 = vmatpush1.bf16.msra.mxu0 %v2011_v9  ;;  %1139 = vmatprep.subr.bf16.mxu1 %v2016_v10  ;;  %v1700_v9 = vld [vmem:[%s2508_s4] ss:$0 sm:$0xff] }
  0xe1   : > { %1225 = vmatprep.subr.bf16.mxu0 %v2019_v11 }
  0xe3   : > { %1140 = vmatpush1.bf16.msra.mxu1 %v2014_v12 }
  0xe4   : > { %1226 = vmatpush1.bf16.msra.mxu0 %v2017_v13  ;;  %1141 = vmatprep.subr.bf16.mxu1 %v2022_v14 }
  0xe5   : > { %1227 = vmatprep.subr.bf16.mxu0 %v2025_v15 }
  0xe7   : > { %1142 = vmatpush1.bf16.msra.mxu1 %v2020_v16 }
  0xe8   : > { %1228 = vmatpush1.bf16.msra.mxu0 %v2023_v17  ;;  %1725 = vmatprep.subr.bf16.mxu1 %v2026_v22 }
  0xea   : > { %1144 = vmatmul.mubr.bf16.vlgmr.msra.gmra.mrb[0].mxu1 %v294_v23 }
  0xeb   : > { %1230 = vmatmul.mubr.bf16.vlgmr.msra.gmra.mrb[0].mxu0 %v298_v24  ;;  %1726 = vmatpush3.bf16.msra.mxu1 %v2027_v25 }
  0xec   : > { %1727 = vmatprep.subr.bf16.mxu1 %v2028_v26 }
  0xef   : > { %1728 = vmatpush3.bf16.msra.mxu1 %v2029_v27 }
  0xf0   : > { %1729 = vmatprep.subr.bf16.mxu1 %v2030_v28 }
  0xf3   : > { %1730 = vmatpush3.bf16.msra.mxu1 %v2031_v29 }
  0xf4   : > { %1731 = vmatprep.subr.bf16.mxu1 %v2032_v30 }
  0xf7   : > { %1732 = vmatpush3.bf16.msra.mxu1 %v2033_v31 }
  0xf8   : > { %1733 = vmatprep.subr.bf16.mxu1 %v2034_v32 }
  0xfb   : > { %1734 = vmatpush3.bf16.msra.mxu1 %v2035_v33 }
  0xfc   : > { %1735 = vmatprep.subr.bf16.mxu1 %v2036_v34 }
  0xff   : > { %1736 = vmatpush3.bf16.msra.mxu1 %v2037_v35 }
 0x100   : > { %1737 = vmatprep.subr.bf16.mxu1 %v2038_v36 }
 0x103   : > { %1738 = vmatpush3.bf16.msra.mxu1 %v2039_v37 }
 0x104   : > { %1739 = vmatprep.subr.bf16.mxu1 %v2040_v38 }
 0x107   : > { %1740 = vmatpush3.bf16.msra.mxu1 %v2041_v39 }
 0x1bd   : > { %v1145_v50 = vpop.f32.mrb[0].mxu1 }
 0x1be   : > { %v1231_v51 = vpop.f32.mrb[0].mxu0  ;;  %v1147_v54 = vpop.f32.mrb[1].mxu1 }
 0x1bf   : > { %v1747_v53 = vadd.f32 %v1231_v51, %v1145_v50  ;;  %v1233_v55 = vpop.f32.mrb[1].mxu0  ;;  %v1149_v57 = vpop.f32.mrb[2].mxu1 }
 0x1c0   : > { %v1748_v56 = vadd.f32 %v1233_v55, %v1147_v54  ;;  %v1235_v58 = vpop.f32.mrb[2].mxu0  ;;  %v1151_v61 = vpop.f32.mrb[3].mxu1 }
 0x1c1   : > { %v1749_v59 = vadd.f32 %v1235_v58, %v1149_v57  ;;  %v1237_v62 = vpop.f32.mrb[3].mxu0 }
 0x1c2   : > { %v1750_v63 = vadd.f32 %v1237_v62, %v1151_v61 }
 0x1c3   : > { %v1240_v1 = vpack.c.bf16 %v1749_v59, %v1747_v53 }
 0x1c4   : > { %v1241_v2 = vpack.c.bf16 %v1750_v63, %v1748_v56 }
 0x1c5   : > { %v1270_v3 = vadd.bf16 %v1262_v60, %v1240_v1 }
 0x1c6   : > { %v1271_v4 = vadd.bf16 %v1269_v0, %v1241_v2 }
 0x1c7   : > { %v1272_v7 = vmax.bf16 %v2208_v5, %v1270_v3 }
 0x1c8   : > { %v1273_v6 = vmax.bf16 %v2208_v5, %v1271_v4 }
 0x1ca   : > { %1441 = vmatprep.mubr.bf16.mxu1 %v1273_v6 }
 0x1cb   : > { %1442 = vmatmul.mubr.bf16.vlgmr.msra.gmra.mrb[4].mxu1 %v1272_v7 }
 0x29e   : > { %v1741_v8 = vpop.f32.mrb[4].mxu1 }
 0x29f   : > { %v1742_v10 = vpop.f32.mrb[5].mxu1 }
 0x2a0   : > { %v1743_v11 = vadd.f32 %v1742_v10, %v1741_v8  ;;  %v1744_v12 = vpop.f32.mrb[6].mxu1 }
 0x2a1   : > { %v1745_v13 = vpop.f32.mrb[7].mxu1 }
 0x2a2   : > { %v1444_v14 = vadd.f32 %v1743_v11, %v1700_v9  ;;  %v1746_v15 = vadd.f32 %v1745_v13, %v1744_v12 }
 0x2a4   : > { %1450 = vst [vmem:[%s272_s13] sm:$0xff] %v1444_v14  ;;  %v1447_v16 = vadd.f32 %v1746_v15, %v1700_v9 }
 0x2a6   : > { %1451 = vst [vmem:[%s272_s13 + $0x8] sm:$0xff] %v1447_v16 }
 0x2a7   : > { %2141 = shalt.err (!%p2138_p2)
}
 0x2a8   : > { %s2142_s24 = scalar_lea.hbm %s2460_s17, 256  ;;  %s2146_s10 = scalar_lea.hbm %s2509_s5, 512 }
 0x2a9   : > { %p2143_p13 = scmp.ne.s32.totalorder %s2460_s17, %s2142_s24  ;;  %p2147_p4 = scmp.lt.u32.totalorder %s2460_s17, %s2509_s5 }
 0x2aa   : > { %p2148_p7 = scmp.lt.u32.totalorder %s2146_s10, %s2142_s24  ;;  %p2150_p11 = scmp.lt.u32.totalorder %s2142_s24, %s2460_s17 }
 0x2ab   : > { %p2144_p6 = pnand %p2143_p13, %p2523_p0 }
 0x2ac   : > { %p2149_p8 = por %p2148_p7, %p2147_p4 }
 0x2ad   : > { %p2145_p10 = pneg %p2144_p6 }
 0x2ae   : > { %p2151_p1 = por %p2150_p11, %p2149_p8 }
 0x2b0   : > { %p2152_p3 = pnand %p2151_p1, %p2145_p10 }
 0x2b2   : > { %2155 = shalt.err (!%p2152_p3)
}
 0x2b3   : > { %s2210_s30 = smov 128   ;;  %s2211_s9 = smov 8  }
 0x2b4   : > { %1769 = dma.vmem_to_hbm [thread:$0]  (%p2523_p0), %s2455_s14, 256, %s2460_s17, %s1453_s15, %s2210_s30, %s2210_s30, %s2211_s9  }
 0x2b5 PF: > { %s1481_s11 = sand.u32 1, %s2186_s18   ;;  %p2524_p5 = scmp.ne.s32.totalorder %s2514_s25, 0 }
 0x2b6   : > { %p2525_p9 = scmp.ge.s32.totalorder %s2198_s21, 2  ;;  %s1482_s7 = scalar_lea.sflag [#allocation4], %s1481_s11 }
 0x2b8   : > { %p1783_p12 = pnand %p2525_p9, %p2524_p5 }
 0x2ba   : > { %2181 = dma.done.wait (!%p1783_p12), %s1482_s7, 256  }
 0x2bb   : > { %2183 = vsyncadd (!%p1783_p12), %s1482_s7, 4294967040  ;;  %p19_p2 = scmp.ge.s32.totalorder %s2354_s16, 4   ;;  %s2526_s18 = smov %s2190_s19 }
 0x2bc   : > { %s2527_s19 = smov %s2194_s20  ;;  %s2528_s20 = smov %s2363_s27 }
 0x2bd   : > { %s2529_s21 = smov %s2354_s16  ;;  %21 = sbr.rel (!%p19_p2) target bundleno = 6 (0x6), region = 93 }
 0x2c4   :  { %1487 = vsyncpa [#allocation3], 1 }
 0x2c5   :  { %1489 = vsyncpa [#allocation3 + $0x1], 1 }
 0x2c6   :  { %1490 = vsyncpa [#allocation6], 1 }
 0x2c7   :  { %1491 = vsyncpa [#allocation4], 1 }
 0x2c8   :  { %1493 = vsyncpa [#allocation4 + $0x1], 1 }

</bundles_post_ra>
